<compile_context>
chip_gen: v5e
topology: v5e:2x2
jax: 0.10.0
libtpu: 0.0.40
codegen_flags: <defaults>
</compile_context>

<pallas_src>
import jax
import jax.numpy as jnp
from jax.experimental import pallas as pl
from jax.experimental.pallas import tpu as pltpu

EPS = 1e-5  # nn.BatchNorm1d default eps


# ----------------------------- Pallas kernel --------------------------------

def make_kernel(bb, H, W, Cpad, HW, wcol, offs):
    o_conv, o_w1, o_w2, o_w3, o_wp1, o_wp2, o_vec = offs
    inv_hw = 1.0 / float(HW)

    def kernel(img_ref, par_ref, p_ref, z_ref, feat_sc):
        f32 = jnp.float32
        i = pl.program_id(0)

        # ---- stem: 3x3 SAME conv as nine shifted K=Cpad tap matmuls --------
        # (no im2col slab; taps are static window loads of the padded image)
        acc = jnp.zeros((bb * HW, wcol), f32)
        for t in range(9):
            dy, dx = divmod(t, 3)
            tap = img_ref[:, dy:dy + H, dx:dx + W, :].reshape(bb * HW, Cpad)
            w_t = par_ref[o_conv + t * Cpad:o_conv + (t + 1) * Cpad, :]
            acc = acc + jnp.dot(tap, w_t, preferred_element_type=f32)
        y = jnp.maximum(acc, 0.0)                          # (bb*HW, wcol) f32

        # ---- global average pool: reshape + reduce (no dense pool matmul) --
        pooled = jnp.sum(y.reshape(bb, HW, wcol), axis=1) * inv_hw
        feat_sc[pl.ds(i * bb, bb), :] = pooled             # (bb, wcol) rows

        # ---- BN-coupled MLP head + predictor: run once, on the last block --
        @pl.when(i == pl.num_programs(0) - 1)
        def _():
            def vrow(r):
                return par_ref[o_vec + r:o_vec + r + 1, :]
            g1, b1, g2, b2 = vrow(0), vrow(1), vrow(2), vrow(3)
            b3, gp1, bp1, bp2 = vrow(4), vrow(5), vrow(6), vrow(7)

            def bn(x, g=None, b=None):
                # BatchNorm1d, training-mode batch stats, centered two-pass
                # variance (f32-safe; padded lanes stay exactly zero).
                mu = jnp.mean(x, axis=0, keepdims=True)
                xc = x - mu
                var = jnp.mean(xc * xc, axis=0, keepdims=True)
                xn = xc * jax.lax.rsqrt(var + EPS)
                return xn * g + b if g is not None else xn

            def mm(x, row):
                # lane-dense (wcol x wcol) f32 matmul against the packed slab
                return jnp.dot(x, par_ref[row:row + wcol, :],
                               preferred_element_type=f32)

            feat = feat_sc[...]                            # (B, wcol)
            a = jnp.maximum(bn(mm(feat, o_w1), g1, b1), 0.0)
            a = jnp.maximum(bn(mm(a, o_w2), g2, b2), 0.0)
            z = bn(mm(a, o_w3) + b3)       # BatchNorm1d(dim, affine=False)
            z_ref[...] = z
            q = jnp.maximum(bn(mm(z, o_wp1), gp1, bp1), 0.0)
            p_ref[...] = mm(q, o_wp2) + bp2                # final Linear: no BN

    return kernel


# ------------------------------ JAX wrapper ----------------------------------

@jax.jit
def simsiam_forward(x_nchw, params):
    # NCHW (PyTorch) -> NHWC.
    x = jnp.transpose(x_nchw, (0, 2, 3, 1)).astype(jnp.float32)
    B, H, W, C = x.shape
    prev = params["w1"].shape[0]
    dim = params["w3"].shape[1]
    pred = params["wp1"].shape[1]
    HW = H * W

    wcol = 128 * ((max(prev, dim, pred) + 127) // 128)   # lane-dense width
    Cpad = ((C + 7) // 8) * 8                            # sublane-pad channels

    # SAME 3x3 halo + channel pad: the ONLY image-sized HBM input (no 9x
    # im2col slab is ever materialized by the wrapper).
    xp = jnp.pad(x, ((0, 0), (1, 1), (1, 1), (0, Cpad - C)))

    # One f32 parameter pack: 9 conv taps (Cpad rows each), 5 dense matrices
    # (each zero-padded to wcol x wcol), 8 BN/bias vector rows.  Static,
    # 8-aligned row offsets; a single lane-dense DMA.
    wconv = jnp.pad(params["w_conv"],
                    ((0, 0), (0, 0), (0, Cpad - C), (0, wcol - prev)))
    blocks = [wconv.reshape(9 * Cpad, wcol)]
    offs = [0]
    row = 9 * Cpad

    def padmat(m):
        return jnp.pad(m, ((0, wcol - m.shape[0]), (0, wcol - m.shape[1])))

    for name in ("w1", "w2", "w3", "wp1", "wp2"):
        offs.append(row)
        blocks.append(padmat(params[name]))
        row += wcol
    offs.append(row)                                     # vector rows offset
    vec_names = ("g1", "b1", "g2", "b2", "b3", "gp1", "bp1", "bp2")
    blocks.append(jnp.stack(
        [jnp.pad(params[k].reshape(-1), (0, wcol - params[k].size))
         for k in vec_names]))
    row += 8
    pack = jnp.concatenate(blocks, axis=0).astype(jnp.float32)

    # Images per grid step.  For a real backbone pick bb so bb*HW is ~512-1024
    # slab rows (bounds per-step VMEM; v7x has only 64 MiB); here B is tiny so
    # bb=1 exercises the pooled-feature accumulator path.
    bb = 1
    assert B % bb == 0
    grid = (B // bb,)

    kernel = make_kernel(bb, H, W, Cpad, HW, wcol, tuple(offs))
    p, z = pl.pallas_call(
        kernel,
        out_shape=(jax.ShapeDtypeStruct((B, wcol), jnp.float32),
                   jax.ShapeDtypeStruct((B, wcol), jnp.float32)),
        grid=grid,
        in_specs=[
            pl.BlockSpec((bb, H + 2, W + 2, Cpad), lambda i: (i, 0, 0, 0)),
            pl.BlockSpec((row, wcol), lambda i: (0, 0)),
        ],
        out_specs=(
            pl.BlockSpec((B, wcol), lambda i: (0, 0)),
            pl.BlockSpec((B, wcol), lambda i: (0, 0)),
        ),
        scratch_shapes=[pltpu.VMEM((B, wcol), jnp.float32)],
        # BN couples the whole batch, so the batch-block axis carries the
        # pooled-feature accumulator -> "arbitrary".
        # TODO(synk): on v7x megacore, accumulate per-core partial features
        # ("parallel") and combine before the BN/MLP tail (or split the stem
        # and the head into two pallas_calls).
        compiler_params=pltpu.CompilerParams(
            dimension_semantics=("arbitrary",)),
    )(xp, pack)
    # Kernel outputs stay lane-dense (wcol); slice to the logical dim in XLA.
    return p[:, :dim], z[:, :dim]


# ---------------------------- reference (plain JAX) --------------------------

@jax.jit
def reference_forward(x_nchw, params):
    hi = jax.lax.Precision.HIGHEST       # match the kernel's f32 datapath
    x = jnp.transpose(x_nchw, (0, 2, 3, 1)).astype(jnp.float32)
    y = jax.lax.conv_general_dilated(
        x, params["w_conv"], window_strides=(1, 1), padding="SAME",
        dimension_numbers=("NHWC", "HWIO", "NHWC"), precision=hi)
    h = jnp.mean(jnp.maximum(y, 0.0), axis=(1, 2))

    def bn(v, g=None, b=None):
        mu = v.mean(0, keepdims=True)
        var = ((v - mu) ** 2).mean(0, keepdims=True)
        o = (v - mu) / jnp.sqrt(var + EPS)
        return o * g + b if g is not None else o

    def dot(a, b):
        return jnp.dot(a, b, precision=hi)

    a = jnp.maximum(bn(dot(h, params["w1"]), params["g1"], params["b1"]), 0.0)
    a = jnp.maximum(bn(dot(a, params["w2"]), params["g2"], params["b2"]), 0.0)
    z = bn(dot(a, params["w3"]) + params["b3"])
    q = jnp.maximum(bn(dot(z, params["wp1"]), params["gp1"], params["bp1"]), 0.0)
    p = dot(q, params["wp2"]) + params["bp2"]
    return p, z


# --------------------------------- main --------------------------------------

def make_params(key, in_ch, prev_dim, dim, pred_dim):
    ks = jax.random.split(key, 12)
    n = jax.random.normal
    return {
        # stand-in backbone stem
        "w_conv": n(ks[0], (3, 3, in_ch, prev_dim), jnp.float32) * 0.1,
        # encoder.fc MLP projection head
        "w1": n(ks[1], (prev_dim, prev_dim), jnp.float32) * 0.05,
        "g1": 1.0 + 0.1 * n(ks[2], (1, prev_dim), jnp.float32),
        "b1": 0.1 * n(ks[3], (1, prev_dim), jnp.float32),
        "w2": n(ks[4], (prev_dim, prev_dim), jnp.float32) * 0.05,
        "g2": 1.0 + 0.1 * n(ks[5], (1, prev_dim), jnp.float32),
        "b2": 0.1 * n(ks[6], (1, prev_dim), jnp.float32),
        "w3": n(ks[7], (prev_dim, dim), jnp.float32) * 0.05,
        "b3": 0.1 * n(ks[8], (1, dim), jnp.float32),
        # predictor
        "wp1": n(ks[9], (dim, pred_dim), jnp.float32) * 0.05,
        "gp1": jnp.ones((1, pred_dim), jnp.float32),
        "bp1": jnp.zeros((1, pred_dim), jnp.float32),
        "wp2": n(ks[10], (pred_dim, dim), jnp.float32) * 0.05,
        "bp2": 0.1 * n(ks[11], (1, dim), jnp.float32),
    }


if __name__ == "__main__":
    B, C, H, W = 2, 4, 16, 16                 # small NCHW batch (PyTorch layout)
    prev_dim, dim, pred_dim = 64, 128, 32

    root = jax.random.PRNGKey(0)
    kx, kp = jax.random.split(root)
    x = jax.random.normal(kx, (B, C, H, W), jnp.float32)
    params = make_params(kp, C, prev_dim, dim, pred_dim)

    p, z = jax.block_until_ready(simsiam_forward(x, params))
    p_ref, z_ref = jax.block_until_ready(reference_forward(x, params))

    assert p.shape == (B, dim) and z.shape == (B, dim)
    assert bool(jnp.all(jnp.isfinite(p))) and bool(jnp.all(jnp.isfinite(z)))
    # All-f32 datapath: expected mismatch is ~1e-4 even through 4 BatchNorm
    # layers (which amplify by 1/sigma_batch); 5e-2 leaves headroom for MXU
    # f32-pass behaviour while still catching any layout/indexing bug (O(1)).
    assert jnp.allclose(p, p_ref, atol=5e-2, rtol=5e-2)
    assert jnp.allclose(z, z_ref, atol=5e-2, rtol=5e-2)
    print("KERNEL_OK")
</pallas_src>

<mosaic_0001>
module attributes {stable_mosaic.version = 11 : i64} {
  func.func @kernel(%arg0: i32, %arg1: memref<1x18x18x8xf32, #tpu.memory_space<vmem>>, %arg2: memref<720x128xf32, #tpu.memory_space<vmem>>, %arg3: memref<2x128xf32, #tpu.memory_space<vmem>>, %arg4: memref<2x128xf32, #tpu.memory_space<vmem>>, %arg5: memref<2x128xf32, #tpu.memory_space<vmem>>) attributes {dimension_semantics = [#tpu.dimension_semantics<arbitrary>], iteration_bounds = array<i64: 2>, scalar_prefetch = 0 : i64, scratch_operands = 1 : i64, tpu.core_type = #tpu.core_type<tc>, window_params = [{transform_indices = @transform_0, window_bounds = array<i64: 1, 18, 18, 8>}, {pipeline_mode = #tpu.pipeline_mode<synchronous>, transform_indices = @transform_1, window_bounds = array<i64: 720, 128>}, {pipeline_mode = #tpu.pipeline_mode<synchronous>, transform_indices = @transform_2, window_bounds = array<i64: 2, 128>}, {pipeline_mode = #tpu.pipeline_mode<synchronous>, transform_indices = @transform_3, window_bounds = array<i64: 2, 128>}]} {
    %cst = arith.constant 0.000000e+00 : f32
    %0 = vector.broadcast %cst : f32 to vector<256x128xf32>
    %c0 = arith.constant 0 : index
    %c0_0 = arith.constant 0 : index
    %c0_1 = arith.constant 0 : index
    %c0_2 = arith.constant 0 : index
    %1 = vector.load %arg1[%c0, %c0_0, %c0_1, %c0_2] : memref<1x18x18x8xf32, #tpu.memory_space<vmem>>, vector<1x16x16x8xf32>
    %2 = vector.shape_cast %1 : vector<1x16x16x8xf32> to vector<256x8xf32>
    %c0_3 = arith.constant 0 : index
    %c0_4 = arith.constant 0 : index
    %3 = vector.load %arg2[%c0_3, %c0_4] : memref<720x128xf32, #tpu.memory_space<vmem>>, vector<8x128xf32>
    %cst_5 = arith.constant dense<0.000000e+00> : vector<256x128xf32>
    %4 = tpu.matmul %2, %3, %cst_5 {dimension_numbers = #tpu.dot_dimension_numbers<[1], [0], [0], [1], [0, 0, 1, 1], [], []>} : vector<256x8xf32>, vector<8x128xf32>, vector<256x128xf32> -> vector<256x128xf32>
    %5 = arith.addf %0, %4 : vector<256x128xf32>
    %c0_6 = arith.constant 0 : index
    %c0_7 = arith.constant 0 : index
    %c1 = arith.constant 1 : index
    %c0_8 = arith.constant 0 : index
    %6 = vector.load %arg1[%c0_6, %c0_7, %c1, %c0_8] : memref<1x18x18x8xf32, #tpu.memory_space<vmem>>, vector<1x16x16x8xf32>
    %7 = vector.shape_cast %6 : vector<1x16x16x8xf32> to vector<256x8xf32>
    %c8 = arith.constant 8 : index
    %c0_9 = arith.constant 0 : index
    %8 = vector.load %arg2[%c8, %c0_9] : memref<720x128xf32, #tpu.memory_space<vmem>>, vector<8x128xf32>
    %cst_10 = arith.constant dense<0.000000e+00> : vector<256x128xf32>
    %9 = tpu.matmul %7, %8, %cst_10 {dimension_numbers = #tpu.dot_dimension_numbers<[1], [0], [0], [1], [0, 0, 1, 1], [], []>} : vector<256x8xf32>, vector<8x128xf32>, vector<256x128xf32> -> vector<256x128xf32>
    %10 = arith.addf %5, %9 : vector<256x128xf32>
    %c0_11 = arith.constant 0 : index
    %c0_12 = arith.constant 0 : index
    %c2 = arith.constant 2 : index
    %c0_13 = arith.constant 0 : index
    %11 = vector.load %arg1[%c0_11, %c0_12, %c2, %c0_13] : memref<1x18x18x8xf32, #tpu.memory_space<vmem>>, vector<1x16x16x8xf32>
    %12 = vector.shape_cast %11 : vector<1x16x16x8xf32> to vector<256x8xf32>
    %c16 = arith.constant 16 : index
    %c0_14 = arith.constant 0 : index
    %13 = vector.load %arg2[%c16, %c0_14] : memref<720x128xf32, #tpu.memory_space<vmem>>, vector<8x128xf32>
    %cst_15 = arith.constant dense<0.000000e+00> : vector<256x128xf32>
    %14 = tpu.matmul %12, %13, %cst_15 {dimension_numbers = #tpu.dot_dimension_numbers<[1], [0], [0], [1], [0, 0, 1, 1], [], []>} : vector<256x8xf32>, vector<8x128xf32>, vector<256x128xf32> -> vector<256x128xf32>
    %15 = arith.addf %10, %14 : vector<256x128xf32>
    %c0_16 = arith.constant 0 : index
    %c1_17 = arith.constant 1 : index
    %c0_18 = arith.constant 0 : index
    %c0_19 = arith.constant 0 : index
    %16 = vector.load %arg1[%c0_16, %c1_17, %c0_18, %c0_19] : memref<1x18x18x8xf32, #tpu.memory_space<vmem>>, vector<1x16x16x8xf32>
    %17 = vector.shape_cast %16 : vector<1x16x16x8xf32> to vector<256x8xf32>
    %c24 = arith.constant 24 : index
    %c0_20 = arith.constant 0 : index
    %18 = vector.load %arg2[%c24, %c0_20] : memref<720x128xf32, #tpu.memory_space<vmem>>, vector<8x128xf32>
    %cst_21 = arith.constant dense<0.000000e+00> : vector<256x128xf32>
    %19 = tpu.matmul %17, %18, %cst_21 {dimension_numbers = #tpu.dot_dimension_numbers<[1], [0], [0], [1], [0, 0, 1, 1], [], []>} : vector<256x8xf32>, vector<8x128xf32>, vector<256x128xf32> -> vector<256x128xf32>
    %20 = arith.addf %15, %19 : vector<256x128xf32>
    %c0_22 = arith.constant 0 : index
    %c1_23 = arith.constant 1 : index
    %c1_24 = arith.constant 1 : index
    %c0_25 = arith.constant 0 : index
    %21 = vector.load %arg1[%c0_22, %c1_23, %c1_24, %c0_25] : memref<1x18x18x8xf32, #tpu.memory_space<vmem>>, vector<1x16x16x8xf32>
    %22 = vector.shape_cast %21 : vector<1x16x16x8xf32> to vector<256x8xf32>
    %c32 = arith.constant 32 : index
    %c0_26 = arith.constant 0 : index
    %23 = vector.load %arg2[%c32, %c0_26] : memref<720x128xf32, #tpu.memory_space<vmem>>, vector<8x128xf32>
    %cst_27 = arith.constant dense<0.000000e+00> : vector<256x128xf32>
    %24 = tpu.matmul %22, %23, %cst_27 {dimension_numbers = #tpu.dot_dimension_numbers<[1], [0], [0], [1], [0, 0, 1, 1], [], []>} : vector<256x8xf32>, vector<8x128xf32>, vector<256x128xf32> -> vector<256x128xf32>
    %25 = arith.addf %20, %24 : vector<256x128xf32>
    %c0_28 = arith.constant 0 : index
    %c1_29 = arith.constant 1 : index
    %c2_30 = arith.constant 2 : index
    %c0_31 = arith.constant 0 : index
    %26 = vector.load %arg1[%c0_28, %c1_29, %c2_30, %c0_31] : memref<1x18x18x8xf32, #tpu.memory_space<vmem>>, vector<1x16x16x8xf32>
    %27 = vector.shape_cast %26 : vector<1x16x16x8xf32> to vector<256x8xf32>
    %c40 = arith.constant 40 : index
    %c0_32 = arith.constant 0 : index
    %28 = vector.load %arg2[%c40, %c0_32] : memref<720x128xf32, #tpu.memory_space<vmem>>, vector<8x128xf32>
    %cst_33 = arith.constant dense<0.000000e+00> : vector<256x128xf32>
    %29 = tpu.matmul %27, %28, %cst_33 {dimension_numbers = #tpu.dot_dimension_numbers<[1], [0], [0], [1], [0, 0, 1, 1], [], []>} : vector<256x8xf32>, vector<8x128xf32>, vector<256x128xf32> -> vector<256x128xf32>
    %30 = arith.addf %25, %29 : vector<256x128xf32>
    %c0_34 = arith.constant 0 : index
    %c2_35 = arith.constant 2 : index
    %c0_36 = arith.constant 0 : index
    %c0_37 = arith.constant 0 : index
    %31 = vector.load %arg1[%c0_34, %c2_35, %c0_36, %c0_37] : memref<1x18x18x8xf32, #tpu.memory_space<vmem>>, vector<1x16x16x8xf32>
    %32 = vector.shape_cast %31 : vector<1x16x16x8xf32> to vector<256x8xf32>
    %c48 = arith.constant 48 : index
    %c0_38 = arith.constant 0 : index
    %33 = vector.load %arg2[%c48, %c0_38] : memref<720x128xf32, #tpu.memory_space<vmem>>, vector<8x128xf32>
    %cst_39 = arith.constant dense<0.000000e+00> : vector<256x128xf32>
    %34 = tpu.matmul %32, %33, %cst_39 {dimension_numbers = #tpu.dot_dimension_numbers<[1], [0], [0], [1], [0, 0, 1, 1], [], []>} : vector<256x8xf32>, vector<8x128xf32>, vector<256x128xf32> -> vector<256x128xf32>
    %35 = arith.addf %30, %34 : vector<256x128xf32>
    %c0_40 = arith.constant 0 : index
    %c2_41 = arith.constant 2 : index
    %c1_42 = arith.constant 1 : index
    %c0_43 = arith.constant 0 : index
    %36 = vector.load %arg1[%c0_40, %c2_41, %c1_42, %c0_43] : memref<1x18x18x8xf32, #tpu.memory_space<vmem>>, vector<1x16x16x8xf32>
    %37 = vector.shape_cast %36 : vector<1x16x16x8xf32> to vector<256x8xf32>
    %c56 = arith.constant 56 : index
    %c0_44 = arith.constant 0 : index
    %38 = vector.load %arg2[%c56, %c0_44] : memref<720x128xf32, #tpu.memory_space<vmem>>, vector<8x128xf32>
    %cst_45 = arith.constant dense<0.000000e+00> : vector<256x128xf32>
    %39 = tpu.matmul %37, %38, %cst_45 {dimension_numbers = #tpu.dot_dimension_numbers<[1], [0], [0], [1], [0, 0, 1, 1], [], []>} : vector<256x8xf32>, vector<8x128xf32>, vector<256x128xf32> -> vector<256x128xf32>
    %40 = arith.addf %35, %39 : vector<256x128xf32>
    %c0_46 = arith.constant 0 : index
    %c2_47 = arith.constant 2 : index
    %c2_48 = arith.constant 2 : index
    %c0_49 = arith.constant 0 : index
    %41 = vector.load %arg1[%c0_46, %c2_47, %c2_48, %c0_49] : memref<1x18x18x8xf32, #tpu.memory_space<vmem>>, vector<1x16x16x8xf32>
    %42 = vector.shape_cast %41 : vector<1x16x16x8xf32> to vector<256x8xf32>
    %c64 = arith.constant 64 : index
    %c0_50 = arith.constant 0 : index
    %43 = vector.load %arg2[%c64, %c0_50] : memref<720x128xf32, #tpu.memory_space<vmem>>, vector<8x128xf32>
    %cst_51 = arith.constant dense<0.000000e+00> : vector<256x128xf32>
    %44 = tpu.matmul %42, %43, %cst_51 {dimension_numbers = #tpu.dot_dimension_numbers<[1], [0], [0], [1], [0, 0, 1, 1], [], []>} : vector<256x8xf32>, vector<8x128xf32>, vector<256x128xf32> -> vector<256x128xf32>
    %45 = arith.addf %40, %44 : vector<256x128xf32>
    %cst_52 = arith.constant 0.000000e+00 : f32
    %46 = vector.broadcast %cst_52 : f32 to vector<256x128xf32>
    %47 = arith.maximumf %45, %46 : vector<256x128xf32>
    %48 = vector.shape_cast %47 : vector<256x128xf32> to vector<1x256x128xf32>
    %cst_53 = arith.constant dense<0.000000e+00> : vector<1x128xf32>
    %49 = vector.multi_reduction <add>, %48, %cst_53 [1] : vector<1x256x128xf32> to vector<1x128xf32>
    %cst_54 = arith.constant 3.906250e-03 : f32
    %50 = vector.broadcast %cst_54 : f32 to vector<1x128xf32>
    %51 = arith.mulf %49, %50 : vector<1x128xf32>
    %c1_i32 = arith.constant 1 : i32
    %52 = arith.muli %arg0, %c1_i32 : i32
    %53 = arith.index_cast %52 : i32 to index
    %c0_55 = arith.constant 0 : index
    %54 = vector.load %arg5[%53, %c0_55] : memref<2x128xf32, #tpu.memory_space<vmem>>, vector<1x128xf32>
    tpu.vector_store %arg5[%53, %c0_55], %51 {strides = array<i32>} : memref<2x128xf32, #tpu.memory_space<vmem>>, vector<1x128xf32>,
    %c1_i32_56 = arith.constant 1 : i32
    %55 = arith.cmpi eq, %arg0, %c1_i32_56 : i32
    %56 = arith.extui %55 : i1 to i32
    %c0_i32 = arith.constant 0 : i32
    %57 = arith.cmpi ne, %56, %c0_i32 : i32
    scf.if %57 {
      %c712 = arith.constant 712 : index
      %c0_57 = arith.constant 0 : index
      %58 = vector.load %arg2[%c712, %c0_57] : memref<720x128xf32, #tpu.memory_space<vmem>>, vector<1x128xf32>
      %c713 = arith.constant 713 : index
      %c0_58 = arith.constant 0 : index
      %59 = vector.load %arg2[%c713, %c0_58] : memref<720x128xf32, #tpu.memory_space<vmem>>, vector<1x128xf32>
      %c714 = arith.constant 714 : index
      %c0_59 = arith.constant 0 : index
      %60 = vector.load %arg2[%c714, %c0_59] : memref<720x128xf32, #tpu.memory_space<vmem>>, vector<1x128xf32>
      %c715 = arith.constant 715 : index
      %c0_60 = arith.constant 0 : index
      %61 = vector.load %arg2[%c715, %c0_60] : memref<720x128xf32, #tpu.memory_space<vmem>>, vector<1x128xf32>
      %c716 = arith.constant 716 : index
      %c0_61 = arith.constant 0 : index
      %62 = vector.load %arg2[%c716, %c0_61] : memref<720x128xf32, #tpu.memory_space<vmem>>, vector<1x128xf32>
      %c717 = arith.constant 717 : index
      %c0_62 = arith.constant 0 : index
      %63 = vector.load %arg2[%c717, %c0_62] : memref<720x128xf32, #tpu.memory_space<vmem>>, vector<1x128xf32>
      %c718 = arith.constant 718 : index
      %c0_63 = arith.constant 0 : index
      %64 = vector.load %arg2[%c718, %c0_63] : memref<720x128xf32, #tpu.memory_space<vmem>>, vector<1x128xf32>
      %c719 = arith.constant 719 : index
      %c0_64 = arith.constant 0 : index
      %65 = vector.load %arg2[%c719, %c0_64] : memref<720x128xf32, #tpu.memory_space<vmem>>, vector<1x128xf32>
      %c0_65 = arith.constant 0 : index
      %c0_66 = arith.constant 0 : index
      %66 = vector.load %arg5[%c0_65, %c0_66] : memref<2x128xf32, #tpu.memory_space<vmem>>, vector<2x128xf32>
      %c72 = arith.constant 72 : index
      %c0_67 = arith.constant 0 : index
      %67 = vector.load %arg2[%c72, %c0_67] : memref<720x128xf32, #tpu.memory_space<vmem>>, vector<128x128xf32>
      %cst_68 = arith.constant dense<0.000000e+00> : vector<2x128xf32>
      %68 = tpu.matmul %66, %67, %cst_68 {dimension_numbers = #tpu.dot_dimension_numbers<[1], [0], [0], [1], [0, 0, 1, 1], [], []>} : vector<2x128xf32>, vector<128x128xf32>, vector<2x128xf32> -> vector<2x128xf32>
      %cst_69 = arith.constant dense<0.000000e+00> : vector<128xf32>
      %69 = vector.multi_reduction <add>, %68, %cst_69 [0] : vector<2x128xf32> to vector<128xf32>
      %70 = vector.shape_cast %69 : vector<128xf32> to vector<1x128xf32>
      %cst_70 = arith.constant 2.000000e+00 : f32
      %71 = vector.broadcast %cst_70 : f32 to vector<1x128xf32>
      %72 = arith.divf %70, %71 : vector<1x128xf32>
      %73 = vector.broadcast %72 : vector<1x128xf32> to vector<2x128xf32>
      %74 = arith.subf %68, %73 : vector<2x128xf32>
      %75 = arith.mulf %74, %74 : vector<2x128xf32>
      %cst_71 = arith.constant dense<0.000000e+00> : vector<128xf32>
      %76 = vector.multi_reduction <add>, %75, %cst_71 [0] : vector<2x128xf32> to vector<128xf32>
      %77 = vector.shape_cast %76 : vector<128xf32> to vector<1x128xf32>
      %cst_72 = arith.constant 2.000000e+00 : f32
      %78 = vector.broadcast %cst_72 : f32 to vector<1x128xf32>
      %79 = arith.divf %77, %78 : vector<1x128xf32>
      %cst_73 = arith.constant 9.99999974E-6 : f32
      %80 = vector.broadcast %cst_73 : f32 to vector<1x128xf32>
      %81 = arith.addf %79, %80 : vector<1x128xf32>
      %82 = math.rsqrt %81 : vector<1x128xf32>
      %83 = vector.broadcast %82 : vector<1x128xf32> to vector<2x128xf32>
      %84 = arith.mulf %74, %83 : vector<2x128xf32>
      %85 = vector.broadcast %58 : vector<1x128xf32> to vector<2x128xf32>
      %86 = arith.mulf %84, %85 : vector<2x128xf32>
      %87 = vector.broadcast %59 : vector<1x128xf32> to vector<2x128xf32>
      %88 = arith.addf %86, %87 : vector<2x128xf32>
      %cst_74 = arith.constant 0.000000e+00 : f32
      %89 = vector.broadcast %cst_74 : f32 to vector<2x128xf32>
      %90 = arith.maximumf %88, %89 : vector<2x128xf32>
      %c200 = arith.constant 200 : index
      %c0_75 = arith.constant 0 : index
      %91 = vector.load %arg2[%c200, %c0_75] : memref<720x128xf32, #tpu.memory_space<vmem>>, vector<128x128xf32>
      %cst_76 = arith.constant dense<0.000000e+00> : vector<2x128xf32>
      %92 = tpu.matmul %90, %91, %cst_76 {dimension_numbers = #tpu.dot_dimension_numbers<[1], [0], [0], [1], [0, 0, 1, 1], [], []>} : vector<2x128xf32>, vector<128x128xf32>, vector<2x128xf32> -> vector<2x128xf32>
      %cst_77 = arith.constant dense<0.000000e+00> : vector<128xf32>
      %93 = vector.multi_reduction <add>, %92, %cst_77 [0] : vector<2x128xf32> to vector<128xf32>
      %94 = vector.shape_cast %93 : vector<128xf32> to vector<1x128xf32>
      %cst_78 = arith.constant 2.000000e+00 : f32
      %95 = vector.broadcast %cst_78 : f32 to vector<1x128xf32>
      %96 = arith.divf %94, %95 : vector<1x128xf32>
      %97 = vector.broadcast %96 : vector<1x128xf32> to vector<2x128xf32>
      %98 = arith.subf %92, %97 : vector<2x128xf32>
      %99 = arith.mulf %98, %98 : vector<2x128xf32>
      %cst_79 = arith.constant dense<0.000000e+00> : vector<128xf32>
      %100 = vector.multi_reduction <add>, %99, %cst_79 [0] : vector<2x128xf32> to vector<128xf32>
      %101 = vector.shape_cast %100 : vector<128xf32> to vector<1x128xf32>
      %cst_80 = arith.constant 2.000000e+00 : f32
      %102 = vector.broadcast %cst_80 : f32 to vector<1x128xf32>
      %103 = arith.divf %101, %102 : vector<1x128xf32>
      %cst_81 = arith.constant 9.99999974E-6 : f32
      %104 = vector.broadcast %cst_81 : f32 to vector<1x128xf32>
      %105 = arith.addf %103, %104 : vector<1x128xf32>
      %106 = math.rsqrt %105 : vector<1x128xf32>
      %107 = vector.broadcast %106 : vector<1x128xf32> to vector<2x128xf32>
      %108 = arith.mulf %98, %107 : vector<2x128xf32>
      %109 = vector.broadcast %60 : vector<1x128xf32> to vector<2x128xf32>
      %110 = arith.mulf %108, %109 : vector<2x128xf32>
      %111 = vector.broadcast %61 : vector<1x128xf32> to vector<2x128xf32>
      %112 = arith.addf %110, %111 : vector<2x128xf32>
      %cst_82 = arith.constant 0.000000e+00 : f32
      %113 = vector.broadcast %cst_82 : f32 to vector<2x128xf32>
      %114 = arith.maximumf %112, %113 : vector<2x128xf32>
      %c328 = arith.constant 328 : index
      %c0_83 = arith.constant 0 : index
      %115 = vector.load %arg2[%c328, %c0_83] : memref<720x128xf32, #tpu.memory_space<vmem>>, vector<128x128xf32>
      %cst_84 = arith.constant dense<0.000000e+00> : vector<2x128xf32>
      %116 = tpu.matmul %114, %115, %cst_84 {dimension_numbers = #tpu.dot_dimension_numbers<[1], [0], [0], [1], [0, 0, 1, 1], [], []>} : vector<2x128xf32>, vector<128x128xf32>, vector<2x128xf32> -> vector<2x128xf32>
      %117 = vector.broadcast %62 : vector<1x128xf32> to vector<2x128xf32>
      %118 = arith.addf %116, %117 : vector<2x128xf32>
      %cst_85 = arith.constant dense<0.000000e+00> : vector<128xf32>
      %119 = vector.multi_reduction <add>, %118, %cst_85 [0] : vector<2x128xf32> to vector<128xf32>
      %120 = vector.shape_cast %119 : vector<128xf32> to vector<1x128xf32>
      %cst_86 = arith.constant 2.000000e+00 : f32
      %121 = vector.broadcast %cst_86 : f32 to vector<1x128xf32>
      %122 = arith.divf %120, %121 : vector<1x128xf32>
      %123 = vector.broadcast %122 : vector<1x128xf32> to vector<2x128xf32>
      %124 = arith.subf %118, %123 : vector<2x128xf32>
      %125 = arith.mulf %124, %124 : vector<2x128xf32>
      %cst_87 = arith.constant dense<0.000000e+00> : vector<128xf32>
      %126 = vector.multi_reduction <add>, %125, %cst_87 [0] : vector<2x128xf32> to vector<128xf32>
      %127 = vector.shape_cast %126 : vector<128xf32> to vector<1x128xf32>
      %cst_88 = arith.constant 2.000000e+00 : f32
      %128 = vector.broadcast %cst_88 : f32 to vector<1x128xf32>
      %129 = arith.divf %127, %128 : vector<1x128xf32>
      %cst_89 = arith.constant 9.99999974E-6 : f32
      %130 = vector.broadcast %cst_89 : f32 to vector<1x128xf32>
      %131 = arith.addf %129, %130 : vector<1x128xf32>
      %132 = math.rsqrt %131 : vector<1x128xf32>
      %133 = vector.broadcast %132 : vector<1x128xf32> to vector<2x128xf32>
      %134 = arith.mulf %124, %133 : vector<2x128xf32>
      %c0_90 = arith.constant 0 : index
      %c0_91 = arith.constant 0 : index
      %135 = vector.load %arg4[%c0_90, %c0_91] : memref<2x128xf32, #tpu.memory_space<vmem>>, vector<2x128xf32>
      tpu.vector_store %arg4[%c0_90, %c0_91], %134 {strides = array<i32>} : memref<2x128xf32, #tpu.memory_space<vmem>>, vector<2x128xf32>,
      %c456 = arith.constant 456 : index
      %c0_92 = arith.constant 0 : index
      %136 = vector.load %arg2[%c456, %c0_92] : memref<720x128xf32, #tpu.memory_space<vmem>>, vector<128x128xf32>
      %cst_93 = arith.constant dense<0.000000e+00> : vector<2x128xf32>
      %137 = tpu.matmul %134, %136, %cst_93 {dimension_numbers = #tpu.dot_dimension_numbers<[1], [0], [0], [1], [0, 0, 1, 1], [], []>} : vector<2x128xf32>, vector<128x128xf32>, vector<2x128xf32> -> vector<2x128xf32>
      %cst_94 = arith.constant dense<0.000000e+00> : vector<128xf32>
      %138 = vector.multi_reduction <add>, %137, %cst_94 [0] : vector<2x128xf32> to vector<128xf32>
      %139 = vector.shape_cast %138 : vector<128xf32> to vector<1x128xf32>
      %cst_95 = arith.constant 2.000000e+00 : f32
      %140 = vector.broadcast %cst_95 : f32 to vector<1x128xf32>
      %141 = arith.divf %139, %140 : vector<1x128xf32>
      %142 = vector.broadcast %141 : vector<1x128xf32> to vector<2x128xf32>
      %143 = arith.subf %137, %142 : vector<2x128xf32>
      %144 = arith.mulf %143, %143 : vector<2x128xf32>
      %cst_96 = arith.constant dense<0.000000e+00> : vector<128xf32>
      %145 = vector.multi_reduction <add>, %144, %cst_96 [0] : vector<2x128xf32> to vector<128xf32>
      %146 = vector.shape_cast %145 : vector<128xf32> to vector<1x128xf32>
      %cst_97 = arith.constant 2.000000e+00 : f32
      %147 = vector.broadcast %cst_97 : f32 to vector<1x128xf32>
      %148 = arith.divf %146, %147 : vector<1x128xf32>
      %cst_98 = arith.constant 9.99999974E-6 : f32
      %149 = vector.broadcast %cst_98 : f32 to vector<1x128xf32>
      %150 = arith.addf %148, %149 : vector<1x128xf32>
      %151 = math.rsqrt %150 : vector<1x128xf32>
      %152 = vector.broadcast %151 : vector<1x128xf32> to vector<2x128xf32>
      %153 = arith.mulf %143, %152 : vector<2x128xf32>
      %154 = vector.broadcast %63 : vector<1x128xf32> to vector<2x128xf32>
      %155 = arith.mulf %153, %154 : vector<2x128xf32>
      %156 = vector.broadcast %64 : vector<1x128xf32> to vector<2x128xf32>
      %157 = arith.addf %155, %156 : vector<2x128xf32>
      %cst_99 = arith.constant 0.000000e+00 : f32
      %158 = vector.broadcast %cst_99 : f32 to vector<2x128xf32>
      %159 = arith.maximumf %157, %158 : vector<2x128xf32>
      %c584 = arith.constant 584 : index
      %c0_100 = arith.constant 0 : index
      %160 = vector.load %arg2[%c584, %c0_100] : memref<720x128xf32, #tpu.memory_space<vmem>>, vector<128x128xf32>
      %cst_101 = arith.constant dense<0.000000e+00> : vector<2x128xf32>
      %161 = tpu.matmul %159, %160, %cst_101 {dimension_numbers = #tpu.dot_dimension_numbers<[1], [0], [0], [1], [0, 0, 1, 1], [], []>} : vector<2x128xf32>, vector<128x128xf32>, vector<2x128xf32> -> vector<2x128xf32>
      %162 = vector.broadcast %65 : vector<1x128xf32> to vector<2x128xf32>
      %163 = arith.addf %161, %162 : vector<2x128xf32>
      %c0_102 = arith.constant 0 : index
      %c0_103 = arith.constant 0 : index
      %164 = vector.load %arg3[%c0_102, %c0_103] : memref<2x128xf32, #tpu.memory_space<vmem>>, vector<2x128xf32>
      tpu.vector_store %arg3[%c0_102, %c0_103], %163 {strides = array<i32>} : memref<2x128xf32, #tpu.memory_space<vmem>>, vector<2x128xf32>,
    } else {
    }
    return
  }
  func.func @transform_0(%arg0: i32) -> (i32, i32, i32, i32) {
    %c0_i32 = arith.constant 0 : i32
    %c0_i32_0 = arith.constant 0 : i32
    %c0_i32_1 = arith.constant 0 : i32
    %c0_i32_2 = arith.constant 0 : i32
    return %arg0, %c0_i32, %c0_i32_0, %c0_i32_1 : i32, i32, i32, i32
  }
  func.func @transform_1(%arg0: i32) -> (i32, i32) {
    %c0_i32 = arith.constant 0 : i32
    %c0_i32_0 = arith.constant 0 : i32
    %c0_i32_1 = arith.constant 0 : i32
    return %c0_i32, %c0_i32_0 : i32, i32
  }
  func.func @transform_2(%arg0: i32) -> (i32, i32) {
    %c0_i32 = arith.constant 0 : i32
    %c0_i32_0 = arith.constant 0 : i32
    %c0_i32_1 = arith.constant 0 : i32
    return %c0_i32, %c0_i32_0 : i32, i32
  }
  func.func @transform_3(%arg0: i32) -> (i32, i32) {
    %c0_i32 = arith.constant 0 : i32
    %c0_i32_0 = arith.constant 0 : i32
    %c0_i32_1 = arith.constant 0 : i32
    return %c0_i32, %c0_i32_0 : i32, i32
  }
}

</mosaic_0001>

<bundles_post_ra>
// kernel: simsiam_forward.1
= control target key start
LH: loop header
LB: loop body
LE: loop exit
PB: predicated region body
PF: predicated region fallthrough
CT: control target
= control target key end

     0   :  { %9 = vsyncpa [#allocation4], 0  ;;  %s5064_s0 = inlined_call_operand.vmem [shape: f32[2,18,18,8], index: 0, kind: input, shape index: {}]   ;;  %s5065_s1 = inlined_call_operand.vmem [shape: f32[720,128], index: 1, kind: input, shape index: {}]   ;;  %s5066_s2 = inlined_call_operand.hbm [shape: f32[2,128], index: 2, kind: output, shape index: {0}]   ;;  %s5067_s3 = inlined_call_operand.hbm [shape: f32[2,128], index: 3, kind: output, shape index: {1}]  }
   0x1   :  { %10 = vsyncpa [#allocation6], 0  ;;  %s3682_s12 = smov 0  }
   0x2 LB: > { %s3688_s13 = sadd.s32 4294967295, %s3657_s12   ;;  %p3049_p0 = scmp.ge.s32.totalorder %s3657_s12, 1  ;;  %s3657_s12 = sphi %s3682_s12, %s16_s12  }
   0x3   : > { %p132_p1 = scmp.lt.s32.totalorder %s3657_s12, 3 }
   0x5   : > { %p133_p2 = pnand %p3049_p0, %p132_p1 }
   0x7   : > { %136 = sbr.rel (%p133_p2) target bundleno = 1677 (0x68d), region = 28 }
   0xc   : > { %v221_v0 = vld [vmem:[%s5065_s1 + $0x8] sm:$0xff]  ;;  %p151_p3 = scmp.lt.s32.totalorder %s3688_s13, 1  ;;  %v673_v1 = vld [vmem:[%s5065_s1 + $0x10] sm:$0xff]  ;;  %v948_v2 = vld [vmem:[%s5065_s1 + $0x18] sm:$0xff]  ;;  %vm222_vm0 = vcmask 64512   ;;  %s3539_s10 = scalar_lea.vmem [#allocation2], %s3657_s12 }
   0xd   : > { %3542 = vmatpush.msra.mxu1 %v221_v0  ;;  %3543 = vmatpush.msra.mxu2 %v221_v0  ;;  %v188_v3 = vld [vmem:[%s5065_s1] sm:$0xff]  ;;  %v1771_v25 = vld [vmem:[%s5065_s1 + $0x30] sm:$0xff]  ;;  %v2045_v26 = vld [vmem:[%s5065_s1 + $0x38] sm:$0xff]  ;;  %p3532_p4 = scmp.ne.s32.totalorder %s3688_s13, 1 }
   0xe   : > { %s152_s22 = scalar_select %p151_p3, %s3688_s13, 1  ;;  %3544 = vmatpush.msra.mxu3 %v221_v0  ;;  %v1222_v4 = vld [vmem:[%s5065_s1 + $0x20] sm:$0xff]  ;;  %334 = vmatpush.msra.mxu0 %v221_v0  ;;  %v1496_v27 = vld [vmem:[%s5065_s1 + $0x28] sm:$0xff] }
   0xf   : > { %785 = vmatpush.msrb.mxu2 %v673_v1  ;;  %543 = vmatpush.msrb.mxu1 %v188_v3  ;;  %v2319_v32 = vld [vmem:[%s5065_s1 + $0x40] sm:$0xff] }
  0x10   : > { %1060 = vmatpush.msrb.mxu3 %v948_v2  ;;  %s3545_s25 = smul.u32 432, %s152_s22  ;;  %1334 = vmatpush.msrb.mxu0 %v1222_v4 }
  0x12   : > { %s3712_s28 = scalar_lea.vmem %s5064_s0, %s3545_s25 }
  0x13   : > { %v3715_v5 = vld [vmem:[%s3712_s28 + $0x61] sm:$0xff]  ;;  %v3732_v9 = vld [vmem:[%s3712_s28 + $0x69] sm:$0xff]  ;;  %v3749_v13 = vld [vmem:[%s3712_s28 + $0x79] sm:$0xff] }
  0x14   : > { %v3718_v6 = vld [vmem:[%s3712_s28 + $0xc1] sm:$0xff]  ;;  %3059 = vmatmul.msk.f32.vlgmr.msra.gmra.mxu1 %vm222_vm0, %v3715_v5  ;;  %v3735_v10 = vld [vmem:[%s3712_s28 + $0xc9] sm:$0xff]  ;;  %v3752_v14 = vld [vmem:[%s3712_s28 + $0xd9] sm:$0xff] }
  0x15   : > { %v3721_v7 = vld [vmem:[%s3712_s28 + $0x121] sm:$0xff]  ;;  %3067 = vmatmul.msk.f32.vlgmr.msra.gmra.mxu2 %vm222_vm0, %v3718_v6  ;;  %v3738_v11 = vld [vmem:[%s3712_s28 + $0x129] sm:$0xff]  ;;  %v3755_v15 = vld [vmem:[%s3712_s28 + $0x139] sm:$0xff]  ;;  %1608 = vmatpush.msra.mxu1 %v1496_v27 }
  0x16   : > { %v189_v8 = vld [vmem:[%s3712_s28 + $0x1] sm:$0xff]  ;;  %3075 = vmatmul.msk.f32.vlgmr.msra.gmra.mxu3 %vm222_vm0, %v3721_v7  ;;  %v190_v12 = vld [vmem:[%s3712_s28 + $0x9] sm:$0xff]  ;;  %v191_v16 = vld [vmem:[%s3712_s28 + $0x19] sm:$0xff]  ;;  %1883 = vmatpush.msra.mxu2 %v1771_v25 }
  0x17   : > { %3051 = vmatmul.msk.f32.vlgmr.msra.gmra.mxu0 %vm222_vm0, %v189_v8  ;;  %v3766_v17 = vld [vmem:[%s3712_s28 + $0x81] sm:$0xff]  ;;  %v3783_v21 = vld [vmem:[%s3712_s28 + $0x91] sm:$0xff]  ;;  %2157 = vmatpush.msra.mxu3 %v2045_v26  ;;  %v3812_v28 = vld [vmem:[%s3712_s28 + $0x99] sm:$0xff] }
  0x18   : > { %v3769_v18 = vld [vmem:[%s3712_s28 + $0xe1] sm:$0xff]  ;;  %v3786_v22 = vld [vmem:[%s3712_s28 + $0xf1] sm:$0xff]  ;;  %v3815_v29 = vld [vmem:[%s3712_s28 + $0xf9] sm:$0xff]  ;;  %2431 = vmatpush.msra.mxu0 %v2319_v32 }
  0x19   : > { %v3772_v19 = vld [vmem:[%s3712_s28 + $0x141] sm:$0xff]  ;;  %v3789_v23 = vld [vmem:[%s3712_s28 + $0x151] sm:$0xff]  ;;  %v3818_v30 = vld [vmem:[%s3712_s28 + $0x159] sm:$0xff] }
  0x1a   : > { %v192_v20 = vld [vmem:[%s3712_s28 + $0x21] sm:$0xff]  ;;  %v3792_v24 = vld [vmem:[%s3712_s28 + $0x31] sm:$0xff]  ;;  %v3821_v31 = vld [vmem:[%s3712_s28 + $0x39] sm:$0xff] }
  0x1b   : > { %v3835_v33 = vld [vmem:[%s3712_s28 + $0xa9] sm:$0xff]  ;;  %v3855_v37 = vld [vmem:[%s3712_s28 + $0xb1] sm:$0xff]  ;;  %v156_v41 = vld [vmem:[%s3712_s28] sm:$0xff] }
  0x1c   : > { %3060 = vmatmul.msk.f32.gmra.mxu1 %vm222_vm0, %v3732_v9  ;;  %v3838_v34 = vld [vmem:[%s3712_s28 + $0x109] sm:$0xff]  ;;  %v3858_v38 = vld [vmem:[%s3712_s28 + $0x111] sm:$0xff]  ;;  %v3148_v46 = vld [vmem:[%s3712_s28 + $0x20] sm:$0xff] }
  0x1d   : > { %3068 = vmatmul.msk.f32.gmra.mxu2 %vm222_vm0, %v3735_v10  ;;  %v3841_v35 = vld [vmem:[%s3712_s28 + $0x169] sm:$0xff]  ;;  %v3861_v39 = vld [vmem:[%s3712_s28 + $0x171] sm:$0xff]  ;;  %v3889_v47 = vld [vmem:[%s3712_s28 + $0x1a] sm:$0xff] }
  0x1e   : > { %3076 = vmatmul.msk.f32.gmra.mxu3 %vm222_vm0, %v3738_v11  ;;  %v3844_v36 = vld [vmem:[%s3712_s28 + $0x49] sm:$0xff]  ;;  %v3864_v40 = vld [vmem:[%s3712_s28 + $0x51] sm:$0xff]  ;;  %v3929_v53 = vld [vmem:[%s3712_s28 + $0x3a] sm:$0xff] }
  0x1f   : > { %3052 = vmatmul.msk.f32.gmra.mxu0 %vm222_vm0, %v190_v12  ;;  %v641_v42 = vld [vmem:[%s3712_s28 + $0x2] sm:$0xff]  ;;  %v3147_v43 = vld [vmem:[%s3712_s28 + $0x18] sm:$0xff]  ;;  %v642_v45 = vld [vmem:[%s3712_s28 + $0xa] sm:$0xff] }
  0x20   : > { %v157_v44 = vld [vmem:[%s3712_s28 + $0x8] sm:$0xff]  ;;  %v3892_v48 = vld [vmem:[%s3712_s28 + $0x30] sm:$0xff]  ;;  %v3905_v50 = vld [vmem:[%s3712_s28 + $0x38] sm:$0xff] }
  0x21   : > { %v3902_v49 = vld [vmem:[%s3712_s28 + $0x22] sm:$0xff]  ;;  %v3915_v51 = vld [vmem:[%s3712_s28 + $0x32] sm:$0xff]  ;;  %v3943_v55 = vld [vmem:[%s3712_s28 + $0x4a] sm:$0xff] }
  0x22   : > { %v3918_v52 = vld [vmem:[%s3712_s28 + $0x48] sm:$0xff]  ;;  %v3932_v54 = vld [vmem:[%s3712_s28 + $0x50] sm:$0xff]  ;;  %v3946_v56 = vld [vmem:[%s3712_s28 + $0x60] sm:$0xff] }
  0x23   : > { %v3957_v57 = vld [vmem:[%s3712_s28 + $0x52] sm:$0xff]  ;;  %v3960_v58 = vld [vmem:[%s3712_s28 + $0x68] sm:$0xff]  ;;  %v3998_v3 = vld [vmem:[%s3712_s28 + $0x80] sm:$0xff] }
  0x24   : > { %3061 = vmatmul.msk.f32.gmra.mxu1 %vm222_vm0, %v3749_v13  ;;  %5096 = vst [vmem:[#allocation9_spill] sm:$0xff] %v3960_v58  ;;  %v3973_v60 = vld [vmem:[%s3712_s28 + $0x62] sm:$0xff]  ;;  %v3976_v61 = vld [vmem:[%s3712_s28 + $0x78] sm:$0xff]  ;;  %v3995_v2 = vld [vmem:[%s3712_s28 + $0x6a] sm:$0xff] }
  0x25   : > { %3069 = vmatmul.msk.f32.gmra.mxu2 %vm222_vm0, %v3752_v14  ;;  %5097 = vst [vmem:[#allocation10_spill] sm:$0xff] %v3976_v61  ;;  %v4017_v12 = vld [vmem:[%s3712_s28 + $0x7a] sm:$0xff]  ;;  %v4039_v26 = vld [vmem:[%s3712_s28 + $0x82] sm:$0xff] }
  0x26   : > { %3077 = vmatmul.msk.f32.gmra.mxu3 %vm222_vm0, %v3755_v15  ;;  %5099 = vst [vmem:[#allocation12_spill] sm:$0xff] %v3995_v2  ;;  %v4042_v27 = vld [vmem:[%s3712_s28 + $0x98] sm:$0xff] }
  0x27   : > { %3053 = vmatmul.msk.f32.gmra.mxu0 %vm222_vm0, %v191_v16  ;;  %5100 = vst [vmem:[#allocation13_spill] sm:$0xff] %v3998_v3 }
  0x28   : > { %5102 = vst [vmem:[#allocation15_spill] sm:$0xff] %v4017_v12 }
  0x29   : > { %5105 = vst [vmem:[#allocation18_spill] sm:$0xff] %v4039_v26 }
  0x2a   : > { %5106 = vst [vmem:[#allocation19_spill] sm:$0xff] %v4042_v27 }
  0x2c   : > { %3062 = vmatmul.msk.f32.gmra.mxu1 %vm222_vm0, %v3766_v17 }
  0x2d   : > { %3070 = vmatmul.msk.f32.gmra.mxu2 %vm222_vm0, %v3769_v18 }
  0x2e   : > { %3078 = vmatmul.msk.f32.gmra.mxu3 %vm222_vm0, %v3772_v19 }
  0x2f   : > { %3054 = vmatmul.msk.f32.gmra.mxu0 %vm222_vm0, %v192_v20 }
  0x34   : > { %3063 = vmatmul.msk.f32.gmra.mxu1 %vm222_vm0, %v3783_v21 }
  0x35   : > { %3071 = vmatmul.msk.f32.gmra.mxu2 %vm222_vm0, %v3786_v22 }
  0x36   : > { %3079 = vmatmul.msk.f32.gmra.mxu3 %vm222_vm0, %v3789_v23 }
  0x37   : > { %3055 = vmatmul.msk.f32.gmra.mxu0 %vm222_vm0, %v3792_v24 }
  0x3c   : > { %3064 = vmatmul.msk.f32.gmra.mxu1 %vm222_vm0, %v3812_v28 }
  0x3d   : > { %3072 = vmatmul.msk.f32.gmra.mxu2 %vm222_vm0, %v3815_v29 }
  0x3e   : > { %3080 = vmatmul.msk.f32.gmra.mxu3 %vm222_vm0, %v3818_v30 }
  0x3f   : > { %3056 = vmatmul.msk.f32.gmra.mxu0 %vm222_vm0, %v3821_v31 }
  0x44   : > { %3065 = vmatmul.msk.f32.gmra.mxu1 %vm222_vm0, %v3835_v33 }
  0x45   : > { %3073 = vmatmul.msk.f32.gmra.mxu2 %vm222_vm0, %v3838_v34 }
  0x46   : > { %3081 = vmatmul.msk.f32.gmra.mxu3 %vm222_vm0, %v3841_v35 }
  0x47   : > { %3057 = vmatmul.msk.f32.gmra.mxu0 %vm222_vm0, %v3844_v36 }
  0x4c   : > { %3066 = vmatmul.msk.f32.gmra.mxu1 %vm222_vm0, %v3855_v37 }
  0x4d   : > { %3074 = vmatmul.msk.f32.gmra.mxu2 %vm222_vm0, %v3858_v38 }
  0x4e   : > { %3082 = vmatmul.msk.f32.gmra.mxu3 %vm222_vm0, %v3861_v39 }
  0x4f   : > { %3058 = vmatmul.msk.f32.gmra.mxu0 %vm222_vm0, %v3864_v40 }
  0x54   : > { %3083 = vmatmul.msk.f32.vlgmr.msrb.gmra.mxu1 %vm222_vm0, %v156_v41 }
  0x55   : > { %3115 = vmatmul.msk.f32.vlgmr.msrb.gmra.mxu2 %vm222_vm0, %v641_v42 }
  0x56   : > { %3179 = vmatmul.msk.f32.vlgmr.msrb.gmra.mxu3 %vm222_vm0, %v3147_v43 }
  0x57   : > { %3243 = vmatmul.msk.f32.vlgmr.msrb.gmra.mxu0 %vm222_vm0, %v191_v16 }
  0x5c   : > { %3084 = vmatmul.msk.f32.gmra.mxu1 %vm222_vm0, %v157_v44  ;;  %v4064_v44 = vld [vmem:[%s3712_s28 + $0xa8] sm:$0xff] }
  0x5d   : > { %3116 = vmatmul.msk.f32.gmra.mxu2 %vm222_vm0, %v642_v45  ;;  %5109 = vst [vmem:[#allocation22_spill] sm:$0xff] %v4064_v44 }
  0x5e   : > { %3180 = vmatmul.msk.f32.gmra.mxu3 %vm222_vm0, %v3148_v46 }
  0x5f   : > { %3244 = vmatmul.msk.f32.gmra.mxu0 %vm222_vm0, %v192_v20 }
  0x64   : > { %3085 = vmatmul.msk.f32.gmra.mxu1 %vm222_vm0, %v3147_v43  ;;  %v4061_v43 = vld [vmem:[%s3712_s28 + $0x92] sm:$0xff] }
  0x65   : > { %3117 = vmatmul.msk.f32.gmra.mxu2 %vm222_vm0, %v3889_v47  ;;  %5108 = vst [vmem:[#allocation21_spill] sm:$0xff] %v4061_v43 }
  0x66   : > { %3181 = vmatmul.msk.f32.gmra.mxu3 %vm222_vm0, %v3892_v48 }
  0x67   : > { %3245 = vmatmul.msk.f32.gmra.mxu0 %vm222_vm0, %v3792_v24 }
  0x6c   : > { %3086 = vmatmul.msk.f32.gmra.mxu1 %vm222_vm0, %v3148_v46 }
  0x6d   : > { %3118 = vmatmul.msk.f32.gmra.mxu2 %vm222_vm0, %v3902_v49 }
  0x6e   : > { %3182 = vmatmul.msk.f32.gmra.mxu3 %vm222_vm0, %v3905_v50 }
  0x6f   : > { %3246 = vmatmul.msk.f32.gmra.mxu0 %vm222_vm0, %v3821_v31 }
  0x74   : > { %3087 = vmatmul.msk.f32.gmra.mxu1 %vm222_vm0, %v3892_v48 }
  0x75   : > { %3119 = vmatmul.msk.f32.gmra.mxu2 %vm222_vm0, %v3915_v51 }
  0x76   : > { %3183 = vmatmul.msk.f32.gmra.mxu3 %vm222_vm0, %v3918_v52 }
  0x77   : > { %3247 = vmatmul.msk.f32.gmra.mxu0 %vm222_vm0, %v3844_v36 }
  0x7c   : > { %3088 = vmatmul.msk.f32.gmra.mxu1 %vm222_vm0, %v3905_v50 }
  0x7d   : > { %3120 = vmatmul.msk.f32.gmra.mxu2 %vm222_vm0, %v3929_v53 }
  0x7e   : > { %3184 = vmatmul.msk.f32.gmra.mxu3 %vm222_vm0, %v3932_v54 }
  0x7f   : > { %3248 = vmatmul.msk.f32.gmra.mxu0 %vm222_vm0, %v3864_v40 }
  0x84   : > { %3089 = vmatmul.msk.f32.gmra.mxu1 %vm222_vm0, %v3918_v52 }
  0x85   : > { %3121 = vmatmul.msk.f32.gmra.mxu2 %vm222_vm0, %v3943_v55 }
  0x86   : > { %3185 = vmatmul.msk.f32.gmra.mxu3 %vm222_vm0, %v3946_v56 }
  0x87   : > { %3249 = vmatmul.msk.f32.gmra.mxu0 %vm222_vm0, %v3715_v5 }
  0x8c   : > { %3090 = vmatmul.msk.f32.gmra.mxu1 %vm222_vm0, %v3932_v54 }
  0x8d   : > { %3122 = vmatmul.msk.f32.gmra.mxu2 %vm222_vm0, %v3957_v57 }
  0x8e   : > { %3186 = vmatmul.msk.f32.gmra.mxu3 %vm222_vm0, %v3960_v58 }
  0x8f   : > { %3250 = vmatmul.msk.f32.gmra.mxu0 %vm222_vm0, %v3732_v9 }
  0x91   : > { %v3970_v59 = vpop.f32.mrf.mxu1 }
  0x94   : > { %v3978_v62 = vpop.f32.mrf.mxu0  ;;  %3091 = vmatmul.msk.f32.gmra.mxu1 %vm222_vm0, %v3946_v56 }
  0x95   : > { %3123 = vmatmul.msk.f32.gmra.mxu2 %vm222_vm0, %v3973_v60 }
  0x96   : > { %3187 = vmatmul.msk.f32.gmra.mxu3 %vm222_vm0, %v3976_v61 }
  0x97   : > { %3251 = vmatmul.msk.f32.gmra.mxu0 %vm222_vm0, %v3749_v13  ;;  %v4020_v13 = vld [vmem:[%s3712_s28 + $0x90] sm:$0xff] }
  0x98   : > { %v3988_v63 = vpop.f32.mrf.mxu2  ;;  %5103 = vst [vmem:[#allocation16_spill] sm:$0xff] %v4020_v13 }
  0x99   : > { %v3990_v0 = vpop.f32.mrf.mxu3  ;;  %v3992_v1 = vpop.f32.mrf.mxu1 }
  0x9a   : > { %5098 = vst [vmem:[#allocation11_spill] sm:$0xff] %v3990_v0 }
  0x9c   : > { %v4000_v4 = vpop.f32.mrf.mxu0  ;;  %3092 = vmatmul.msk.f32.gmra.mxu1 %vm222_vm0, %v3960_v58  ;;  %v4165_v58 = vld [vmem:[%s3712_s28 + $0xe0] sm:$0xff] }
  0x9d   : > { %3124 = vmatmul.msk.f32.gmra.mxu2 %vm222_vm0, %v3995_v2  ;;  %v4162_v2 = vld [vmem:[%s3712_s28 + $0xca] sm:$0xff] }
  0x9e   : > { %3188 = vmatmul.msk.f32.gmra.mxu3 %vm222_vm0, %v3998_v3 }
  0x9f   : > { %3252 = vmatmul.msk.f32.gmra.mxu0 %vm222_vm0, %v3766_v17 }
  0xa0   : > { %v4010_v5 = vpop.f32.mrf.mxu2 }
  0xa1   : > { %v4012_v8 = vpop.f32.mrf.mxu3  ;;  %v4014_v9 = vpop.f32.mrf.mxu1 }
  0xa2   : > { %5101 = vst [vmem:[#allocation14_spill] sm:$0xff] %v4012_v8  ;;  %v4086_v8 = vld [vmem:[%s3712_s28 + $0xb0] sm:$0xff] }
  0xa3   : > { %5113 = vst [vmem:[#allocation26_spill] sm:$0xff] %v4086_v8 }
  0xa4   : > { %v4022_v16 = vpop.f32.mrf.mxu0  ;;  %3093 = vmatmul.msk.f32.gmra.mxu1 %vm222_vm0, %v3976_v61  ;;  %v4150_v61 = vld [vmem:[%s3712_s28 + $0xd8] sm:$0xff] }
  0xa5   : > { %3125 = vmatmul.msk.f32.gmra.mxu2 %vm222_vm0, %v4017_v12 }
  0xa6   : > { %3189 = vmatmul.msk.f32.gmra.mxu3 %vm222_vm0, %v4020_v13 }
  0xa7   : > { %3253 = vmatmul.msk.f32.gmra.mxu0 %vm222_vm0, %v3783_v21 }
  0xa8   : > { %v4032_v17 = vpop.f32.mrf.mxu2 }
  0xa9   : > { %v4034_v20 = vpop.f32.mrf.mxu3  ;;  %v4036_v25 = vpop.f32.mrf.mxu1 }
  0xaa   : > { %5104 = vst [vmem:[#allocation17_spill] sm:$0xff] %v4034_v20  ;;  %v4083_v20 = vld [vmem:[%s3712_s28 + $0x9a] sm:$0xff] }
  0xab   : > { %5112 = vst [vmem:[#allocation25_spill] sm:$0xff] %v4083_v20 }
  0xac   : > { %v4044_v32 = vpop.f32.mrf.mxu0  ;;  %3094 = vmatmul.msk.f32.gmra.mxu1 %vm222_vm0, %v3998_v3  ;;  %v4127_v3 = vld [vmem:[%s3712_s28 + $0xb2] sm:$0xff] }
  0xad   : > { %3126 = vmatmul.msk.f32.gmra.mxu2 %vm222_vm0, %v4039_v26  ;;  %5120 = vst [vmem:[#allocation33_spill] sm:$0xff] %v4127_v3 }
  0xae   : > { %3190 = vmatmul.msk.f32.gmra.mxu3 %vm222_vm0, %v4042_v27 }
  0xaf   : > { %3254 = vmatmul.msk.f32.gmra.mxu0 %vm222_vm0, %v3812_v28 }
  0xb0   : > { %v4054_v21 = vpop.f32.mrf.mxu2 }
  0xb1   : > { %v4056_v41 = vpop.f32.mrf.mxu3  ;;  %v4058_v42 = vpop.f32.mrf.mxu1 }
  0xb2   : > { %5107 = vst [vmem:[#allocation20_spill] sm:$0xff] %v4056_v41 }
  0xb4   : > { %v4066_v45 = vpop.f32.mrf.mxu0  ;;  %3095 = vmatmul.msk.f32.gmra.mxu1 %vm222_vm0, %v4020_v13  ;;  %v4105_v13 = vld [vmem:[%s3712_s28 + $0xaa] sm:$0xff] }
  0xb5   : > { %3127 = vmatmul.msk.f32.gmra.mxu2 %vm222_vm0, %v4061_v43  ;;  %5116 = vst [vmem:[#allocation29_spill] sm:$0xff] %v4105_v13 }
  0xb6   : > { %3191 = vmatmul.msk.f32.gmra.mxu3 %vm222_vm0, %v4064_v44 }
  0xb7   : > { %3255 = vmatmul.msk.f32.gmra.mxu0 %vm222_vm0, %v3835_v33 }
  0xb8   : > { %v4076_v28 = vpop.f32.mrf.mxu2 }
  0xb9   : > { %5110 = vst [vmem:[#allocation23_spill] sm:$0xff] %v4076_v28  ;;  %v4078_v46 = vpop.f32.mrf.mxu3  ;;  %v4080_v41 = vpop.f32.mrf.mxu1 }
  0xba   : > { %5111 = vst [vmem:[#allocation24_spill] sm:$0xff] %v4078_v46 }
  0xbc   : > { %v4088_v0 = vpop.f32.mrf.mxu0  ;;  %3096 = vmatmul.msk.f32.gmra.mxu1 %vm222_vm0, %v4042_v27  ;;  %v4108_v27 = vld [vmem:[%s3712_s28 + $0xc0] sm:$0xff] }
  0xbd   : > { %3128 = vmatmul.msk.f32.gmra.mxu2 %vm222_vm0, %v4083_v20  ;;  %5117 = vst [vmem:[#allocation30_spill] sm:$0xff] %v4108_v27 }
  0xbe   : > { %3192 = vmatmul.msk.f32.gmra.mxu3 %vm222_vm0, %v4086_v8 }
  0xbf   : > { %3256 = vmatmul.msk.f32.gmra.mxu0 %vm222_vm0, %v3855_v37 }
  0xc0   : > { %v4098_v33 = vpop.f32.mrf.mxu2 }
  0xc1   : > { %5114 = vst [vmem:[#allocation27_spill] sm:$0xff] %v4098_v33  ;;  %v4100_v46 = vpop.f32.mrf.mxu3  ;;  %v4102_v43 = vpop.f32.mrf.mxu1 }
  0xc2   : > { %5115 = vst [vmem:[#allocation28_spill] sm:$0xff] %v4100_v46 }
  0xc4   : > { %v4110_v26 = vpop.f32.mrf.mxu0  ;;  %3097 = vmatmul.msk.f32.gmra.mxu1 %vm222_vm0, %v4064_v44  ;;  %v4130_v44 = vld [vmem:[%s3712_s28 + $0xc8] sm:$0xff] }
  0xc5   : > { %3129 = vmatmul.msk.f32.gmra.mxu2 %vm222_vm0, %v4105_v13 }
  0xc6   : > { %3193 = vmatmul.msk.f32.gmra.mxu3 %vm222_vm0, %v4108_v27 }
  0xc7   : > { %3257 = vmatmul.msk.f32.gmra.mxu0 %vm222_vm0, %v3718_v6 }
  0xc8   : > { %v4120_v37 = vpop.f32.mrf.mxu2 }
  0xc9   : > { %5118 = vst [vmem:[#allocation31_spill] sm:$0xff] %v4120_v37  ;;  %v4122_v46 = vpop.f32.mrf.mxu3  ;;  %v4124_v20 = vpop.f32.mrf.mxu1  ;;  %v4147_v37 = vld [vmem:[%s3712_s28 + $0xc2] sm:$0xff] }
  0xca   : > { %5119 = vst [vmem:[#allocation32_spill] sm:$0xff] %v4122_v46 }
  0xcb   : > { %5123 = vst [vmem:[#allocation36_spill] sm:$0xff] %v4147_v37 }
  0xcc   : > { %v4132_v12 = vpop.f32.mrf.mxu0  ;;  %3098 = vmatmul.msk.f32.gmra.mxu1 %vm222_vm0, %v4086_v8 }
  0xcd   : > { %3130 = vmatmul.msk.f32.gmra.mxu2 %vm222_vm0, %v4127_v3 }
  0xce   : > { %3194 = vmatmul.msk.f32.gmra.mxu3 %vm222_vm0, %v4130_v44 }
  0xcf   : > { %3258 = vmatmul.msk.f32.gmra.mxu0 %vm222_vm0, %v3735_v10 }
  0xd0   : > { %v4142_v6 = vpop.f32.mrf.mxu2 }
  0xd1   : > { %5121 = vst [vmem:[#allocation34_spill] sm:$0xff] %v4142_v6  ;;  %v4144_v46 = vpop.f32.mrf.mxu3  ;;  %v545_v13 = vpop.f32.mrf.mxu1 }
  0xd2   : > { %5122 = vst [vmem:[#allocation35_spill] sm:$0xff] %v4144_v46  ;;  %v546_v10 = vadd.f32 %v545_v13, %v3978_v62 }
  0xd4   : > { %v1336_v8 = vpop.f32.mrf.mxu0  ;;  %3099 = vmatmul.msk.f32.gmra.mxu1 %vm222_vm0, %v4108_v27 }
  0xd5   : > { %3131 = vmatmul.msk.f32.gmra.mxu2 %vm222_vm0, %v4147_v37 }
  0xd6   : > { %3195 = vmatmul.msk.f32.gmra.mxu3 %vm222_vm0, %v4150_v61 }
  0xd7   : > { %3259 = vmatmul.msk.f32.gmra.mxu0 %vm222_vm0, %v3752_v14 }
  0xd8   : > { %v787_v46 = vpop.f32.mrf.mxu2 }
  0xd9   : > { %v883_v3 = vadd.f32 %v787_v46, %v546_v10  ;;  %v1062_v6 = vpop.f32.mrf.mxu3  ;;  %v548_v33 = vpop.f32.mrf.mxu1 }
  0xda   : > { %v549_v14 = vadd.f32 %v548_v33, %v4000_v4 }
  0xdb   : > { %v1158_v27 = vadd.f32 %v1062_v6, %v883_v3  ;;  %v4182_v6 = vld [vmem:[%s3712_s28 + $0xf0] sm:$0xff] }
  0xdc   : > { %v1339_v37 = vpop.f32.mrf.mxu0  ;;  %3100 = vmatmul.msk.f32.gmra.mxu1 %vm222_vm0, %v4130_v44 }
  0xdd   : > { %v4167_v28 = vadd.f32 %v1336_v8, %v1158_v27  ;;  %3132 = vmatmul.msk.f32.gmra.mxu2 %vm222_vm0, %v4162_v2  ;;  %v4179_v27 = vld [vmem:[%s3712_s28 + $0xda] sm:$0xff] }
  0xde   : > { %3196 = vmatmul.msk.f32.gmra.mxu3 %vm222_vm0, %v4165_v58 }
  0xdf   : > { %5124 = vst [vmem:[#allocation37_spill] sm:$0xff] %v4167_v28  ;;  %3260 = vmatmul.msk.f32.gmra.mxu0 %vm222_vm0, %v3769_v18 }
  0xe0   : > { %v790_v62 = vpop.f32.mrf.mxu2 }
  0xe1   : > { %v884_v3 = vadd.f32 %v790_v62, %v549_v14  ;;  %v1065_v13 = vpop.f32.mrf.mxu3  ;;  %v551_v8 = vpop.f32.mrf.mxu1  ;;  %v4196_v62 = vld [vmem:[%s3712_s28 + $0xe2] sm:$0xff] }
  0xe2   : > { %v552_v18 = vadd.f32 %v551_v8, %v4022_v16 }
  0xe3   : > { %v1159_v46 = vadd.f32 %v1065_v13, %v884_v3  ;;  %v4199_v13 = vld [vmem:[%s3712_s28 + $0xf8] sm:$0xff] }
  0xe4   : > { %v1342_v10 = vpop.f32.mrf.mxu0  ;;  %3101 = vmatmul.msk.f32.gmra.mxu1 %vm222_vm0, %v4150_v61 }
  0xe5   : > { %v4184_v28 = vadd.f32 %v1339_v37, %v1159_v46  ;;  %3133 = vmatmul.msk.f32.gmra.mxu2 %vm222_vm0, %v4179_v27 }
  0xe6   : > { %3197 = vmatmul.msk.f32.gmra.mxu3 %vm222_vm0, %v4182_v6 }
  0xe7   : > { %5125 = vst [vmem:[#allocation38_spill] sm:$0xff] %v4184_v28  ;;  %3261 = vmatmul.msk.f32.gmra.mxu0 %vm222_vm0, %v3786_v22 }
  0xe8   : > { %v793_v4 = vpop.f32.mrf.mxu2 }
  0xe9   : > { %v885_v33 = vadd.f32 %v793_v4, %v552_v18  ;;  %v1068_v14 = vpop.f32.mrf.mxu3  ;;  %v554_v37 = vpop.f32.mrf.mxu1  ;;  %v4213_v4 = vld [vmem:[%s3712_s28 + $0xf2] sm:$0xff] }
  0xea   : > { %v555_v22 = vadd.f32 %v554_v37, %v4044_v32 }
  0xeb   : > { %v1160_v3 = vadd.f32 %v1068_v14, %v885_v33  ;;  %v4216_v14 = vld [vmem:[%s3712_s28 + $0x108] sm:$0xff] }
  0xec   : > { %v1345_v46 = vpop.f32.mrf.mxu0  ;;  %3102 = vmatmul.msk.f32.gmra.mxu1 %vm222_vm0, %v4165_v58 }
  0xed   : > { %v4201_v28 = vadd.f32 %v1342_v10, %v1160_v3  ;;  %3134 = vmatmul.msk.f32.gmra.mxu2 %vm222_vm0, %v4196_v62 }
  0xee   : > { %3198 = vmatmul.msk.f32.gmra.mxu3 %vm222_vm0, %v4199_v13 }
  0xef   : > { %5126 = vst [vmem:[#allocation39_spill] sm:$0xff] %v4201_v28  ;;  %3262 = vmatmul.msk.f32.gmra.mxu0 %vm222_vm0, %v3815_v29 }
  0xf0   : > { %v796_v16 = vpop.f32.mrf.mxu2 }
  0xf1   : > { %v886_v8 = vadd.f32 %v796_v16, %v555_v22  ;;  %v1071_v18 = vpop.f32.mrf.mxu3  ;;  %v557_v10 = vpop.f32.mrf.mxu1  ;;  %v4230_v16 = vld [vmem:[%s3712_s28 + $0xfa] sm:$0xff] }
  0xf2   : > { %v558_v29 = vadd.f32 %v557_v10, %v4066_v45 }
  0xf3   : > { %v1161_v33 = vadd.f32 %v1071_v18, %v886_v8  ;;  %v4233_v18 = vld [vmem:[%s3712_s28 + $0x110] sm:$0xff] }
  0xf4   : > { %v1348_v3 = vpop.f32.mrf.mxu0  ;;  %3103 = vmatmul.msk.f32.gmra.mxu1 %vm222_vm0, %v4182_v6 }
  0xf5   : > { %v4218_v28 = vadd.f32 %v1345_v46, %v1161_v33  ;;  %3135 = vmatmul.msk.f32.gmra.mxu2 %vm222_vm0, %v4213_v4 }
  0xf6   : > { %3199 = vmatmul.msk.f32.gmra.mxu3 %vm222_vm0, %v4216_v14 }
  0xf7   : > { %5127 = vst [vmem:[#allocation40_spill] sm:$0xff] %v4218_v28  ;;  %3263 = vmatmul.msk.f32.gmra.mxu0 %vm222_vm0, %v3838_v34 }
  0xf8   : > { %v799_v32 = vpop.f32.mrf.mxu2 }
  0xf9   : > { %v887_v37 = vadd.f32 %v799_v32, %v558_v29  ;;  %v1074_v22 = vpop.f32.mrf.mxu3  ;;  %v560_v46 = vpop.f32.mrf.mxu1  ;;  %v4247_v32 = vld [vmem:[%s3712_s28 + $0x10a] sm:$0xff] }
  0xfa   : > { %v561_v34 = vadd.f32 %v560_v46, %v4088_v0 }
  0xfb   : > { %v1162_v8 = vadd.f32 %v1074_v22, %v887_v37  ;;  %v4250_v22 = vld [vmem:[%s3712_s28 + $0x120] sm:$0xff] }
  0xfc   : > { %v1351_v33 = vpop.f32.mrf.mxu0  ;;  %3104 = vmatmul.msk.f32.gmra.mxu1 %vm222_vm0, %v4199_v13 }
  0xfd   : > { %v4235_v28 = vadd.f32 %v1348_v3, %v1162_v8  ;;  %3136 = vmatmul.msk.f32.gmra.mxu2 %vm222_vm0, %v4230_v16 }
  0xfe   : > { %3200 = vmatmul.msk.f32.gmra.mxu3 %vm222_vm0, %v4233_v18 }
  0xff   : > { %5128 = vst [vmem:[#allocation41_spill] sm:$0xff] %v4235_v28  ;;  %3264 = vmatmul.msk.f32.gmra.mxu0 %vm222_vm0, %v3858_v38 }
 0x100   : > { %v802_v45 = vpop.f32.mrf.mxu2 }
 0x101   : > { %v888_v10 = vadd.f32 %v802_v45, %v561_v34  ;;  %v1077_v29 = vpop.f32.mrf.mxu3  ;;  %v563_v3 = vpop.f32.mrf.mxu1  ;;  %v4264_v45 = vld [vmem:[%s3712_s28 + $0x112] sm:$0xff] }
 0x102   : > { %v564_v38 = vadd.f32 %v563_v3, %v4110_v26 }
 0x103   : > { %v1163_v37 = vadd.f32 %v1077_v29, %v888_v10  ;;  %v4267_v29 = vld [vmem:[%s3712_s28 + $0x128] sm:$0xff] }
 0x104   : > { %v1354_v8 = vpop.f32.mrf.mxu0  ;;  %3105 = vmatmul.msk.f32.gmra.mxu1 %vm222_vm0, %v4216_v14 }
 0x105   : > { %v4252_v28 = vadd.f32 %v1351_v33, %v1163_v37  ;;  %3137 = vmatmul.msk.f32.gmra.mxu2 %vm222_vm0, %v4247_v32 }
 0x106   : > { %3201 = vmatmul.msk.f32.gmra.mxu3 %vm222_vm0, %v4250_v22 }
 0x107   : > { %5129 = vst [vmem:[#allocation42_spill] sm:$0xff] %v4252_v28  ;;  %3265 = vmatmul.msk.f32.gmra.mxu0 %vm222_vm0, %v3721_v7 }
 0x108   : > { %v805_v0 = vpop.f32.mrf.mxu2 }
 0x109   : > { %v889_v46 = vadd.f32 %v805_v0, %v564_v38  ;;  %v1080_v34 = vpop.f32.mrf.mxu3  ;;  %v566_v33 = vpop.f32.mrf.mxu1  ;;  %v4281_v0 = vld [vmem:[%s3712_s28 + $0x122] sm:$0xff] }
 0x10a   : > { %v567_v7 = vadd.f32 %v566_v33, %v4132_v12 }
 0x10b   : > { %v1164_v10 = vadd.f32 %v1080_v34, %v889_v46  ;;  %v4284_v34 = vld [vmem:[%s3712_s28 + $0x138] sm:$0xff] }
 0x10c   : > { %v1357_v37 = vpop.f32.mrf.mxu0  ;;  %3106 = vmatmul.msk.f32.gmra.mxu1 %vm222_vm0, %v4233_v18 }
 0x10d   : > { %v4269_v28 = vadd.f32 %v1354_v8, %v1164_v10  ;;  %3138 = vmatmul.msk.f32.gmra.mxu2 %vm222_vm0, %v4264_v45 }
 0x10e   : > { %3202 = vmatmul.msk.f32.gmra.mxu3 %vm222_vm0, %v4267_v29 }
 0x10f   : > { %5130 = vst [vmem:[#allocation43_spill] sm:$0xff] %v4269_v28  ;;  %3266 = vmatmul.msk.f32.gmra.mxu0 %vm222_vm0, %v3738_v11 }
 0x110   : > { %v808_v26 = vpop.f32.mrf.mxu2 }
 0x111   : > { %v890_v3 = vadd.f32 %v808_v26, %v567_v7  ;;  %v1083_v38 = vpop.f32.mrf.mxu3  ;;  %v569_v8 = vpop.f32.mrf.mxu1  ;;  %v4298_v26 = vld [vmem:[%s3712_s28 + $0x12a] sm:$0xff] }
 0x112   : > { %v570_v11 = vadd.f32 %v569_v8, %v3970_v59 }
 0x113   : > { %v1165_v46 = vadd.f32 %v1083_v38, %v890_v3  ;;  %v4301_v38 = vld [vmem:[%s3712_s28 + $0x140] sm:$0xff] }
 0x114   : > { %v1360_v10 = vpop.f32.mrf.mxu0  ;;  %3107 = vmatmul.msk.f32.gmra.mxu1 %vm222_vm0, %v4250_v22 }
 0x115   : > { %v4286_v28 = vadd.f32 %v1357_v37, %v1165_v46  ;;  %3139 = vmatmul.msk.f32.gmra.mxu2 %vm222_vm0, %v4281_v0 }
 0x116   : > { %3203 = vmatmul.msk.f32.gmra.mxu3 %vm222_vm0, %v4284_v34 }
 0x117   : > { %5131 = vst [vmem:[#allocation44_spill] sm:$0xff] %v4286_v28  ;;  %3267 = vmatmul.msk.f32.gmra.mxu0 %vm222_vm0, %v3755_v15 }
 0x118   : > { %v811_v12 = vpop.f32.mrf.mxu2 }
 0x119   : > { %v891_v33 = vadd.f32 %v811_v12, %v570_v11  ;;  %v1086_v7 = vpop.f32.mrf.mxu3  ;;  %v572_v37 = vpop.f32.mrf.mxu1  ;;  %v4315_v12 = vld [vmem:[%s3712_s28 + $0x13a] sm:$0xff] }
 0x11a   : > { %v573_v15 = vadd.f32 %v572_v37, %v3992_v1 }
 0x11b   : > { %v1166_v3 = vadd.f32 %v1086_v7, %v891_v33  ;;  %v4318_v7 = vld [vmem:[%s3712_s28 + $0x150] sm:$0xff] }
 0x11c   : > { %v1363_v46 = vpop.f32.mrf.mxu0  ;;  %3108 = vmatmul.msk.f32.gmra.mxu1 %vm222_vm0, %v4267_v29 }
 0x11d   : > { %v4303_v28 = vadd.f32 %v1360_v10, %v1166_v3  ;;  %3140 = vmatmul.msk.f32.gmra.mxu2 %vm222_vm0, %v4298_v26 }
 0x11e   : > { %3204 = vmatmul.msk.f32.gmra.mxu3 %vm222_vm0, %v4301_v38 }
 0x11f   : > { %5132 = vst [vmem:[#allocation45_spill] sm:$0xff] %v4303_v28  ;;  %3268 = vmatmul.msk.f32.gmra.mxu0 %vm222_vm0, %v3772_v19 }
 0x120   : > { %v814_v59 = vpop.f32.mrf.mxu2 }
 0x121   : > { %v892_v8 = vadd.f32 %v814_v59, %v573_v15  ;;  %v1089_v11 = vpop.f32.mrf.mxu3  ;;  %v575_v10 = vpop.f32.mrf.mxu1  ;;  %v4332_v59 = vld [vmem:[%s3712_s28 + $0x142] sm:$0xff] }
 0x122   : > { %v576_v19 = vadd.f32 %v575_v10, %v4014_v9 }
 0x123   : > { %v1167_v33 = vadd.f32 %v1089_v11, %v892_v8  ;;  %v4335_v11 = vld [vmem:[%s3712_s28 + $0x158] sm:$0xff] }
 0x124   : > { %v1366_v3 = vpop.f32.mrf.mxu0  ;;  %3109 = vmatmul.msk.f32.gmra.mxu1 %vm222_vm0, %v4284_v34 }
 0x125   : > { %v4320_v28 = vadd.f32 %v1363_v46, %v1167_v33  ;;  %3141 = vmatmul.msk.f32.gmra.mxu2 %vm222_vm0, %v4315_v12 }
 0x126   : > { %3205 = vmatmul.msk.f32.gmra.mxu3 %vm222_vm0, %v4318_v7 }
 0x127   : > { %5133 = vst [vmem:[#allocation46_spill] sm:$0xff] %v4320_v28  ;;  %3269 = vmatmul.msk.f32.gmra.mxu0 %vm222_vm0, %v3789_v23 }
 0x128   : > { %v817_v1 = vpop.f32.mrf.mxu2 }
 0x129   : > { %v893_v37 = vadd.f32 %v817_v1, %v576_v19  ;;  %v1092_v15 = vpop.f32.mrf.mxu3  ;;  %v578_v46 = vpop.f32.mrf.mxu1  ;;  %v4349_v1 = vld [vmem:[%s3712_s28 + $0x152] sm:$0xff] }
 0x12a   : > { %v579_v23 = vadd.f32 %v578_v46, %v4036_v25 }
 0x12b   : > { %v1168_v8 = vadd.f32 %v1092_v15, %v893_v37  ;;  %v4352_v15 = vld [vmem:[%s3712_s28 + $0x168] sm:$0xff] }
 0x12c   : > { %v1369_v33 = vpop.f32.mrf.mxu0  ;;  %3110 = vmatmul.msk.f32.gmra.mxu1 %vm222_vm0, %v4301_v38 }
 0x12d   : > { %v4337_v28 = vadd.f32 %v1366_v3, %v1168_v8  ;;  %3142 = vmatmul.msk.f32.gmra.mxu2 %vm222_vm0, %v4332_v59 }
 0x12e   : > { %3206 = vmatmul.msk.f32.gmra.mxu3 %vm222_vm0, %v4335_v11 }
 0x12f   : > { %5134 = vst [vmem:[#allocation47_spill] sm:$0xff] %v4337_v28  ;;  %3270 = vmatmul.msk.f32.gmra.mxu0 %vm222_vm0, %v3818_v30 }
 0x130   : > { %v820_v9 = vpop.f32.mrf.mxu2 }
 0x131   : > { %v894_v10 = vadd.f32 %v820_v9, %v579_v23  ;;  %v1095_v19 = vpop.f32.mrf.mxu3  ;;  %v581_v3 = vpop.f32.mrf.mxu1  ;;  %v4366_v9 = vld [vmem:[%s3712_s28 + $0x15a] sm:$0xff] }
 0x132   : > { %v582_v30 = vadd.f32 %v581_v3, %v4058_v42  ;;  %5136 = vst [vmem:[#allocation49_spill] sm:$0xff] %v4366_v9 }
 0x133   : > { %v1169_v37 = vadd.f32 %v1095_v19, %v894_v10  ;;  %v4369_v19 = vld [vmem:[%s3712_s28 + $0x170] sm:$0xff] }
 0x134   : > { %v1372_v8 = vpop.f32.mrf.mxu0  ;;  %3111 = vmatmul.msk.f32.gmra.mxu1 %vm222_vm0, %v4318_v7 }
 0x135   : > { %v4354_v28 = vadd.f32 %v1369_v33, %v1169_v37  ;;  %3143 = vmatmul.msk.f32.gmra.mxu2 %vm222_vm0, %v4349_v1 }
 0x136   : > { %3207 = vmatmul.msk.f32.gmra.mxu3 %vm222_vm0, %v4352_v15 }
 0x137   : > { %5135 = vst [vmem:[#allocation48_spill] sm:$0xff] %v4354_v28  ;;  %3271 = vmatmul.msk.f32.gmra.mxu0 %vm222_vm0, %v3841_v35 }
 0x138   : > { %v823_v25 = vpop.f32.mrf.mxu2 }
 0x139   : > { %v895_v46 = vadd.f32 %v823_v25, %v582_v30  ;;  %v1098_v23 = vpop.f32.mrf.mxu3  ;;  %v584_v33 = vpop.f32.mrf.mxu1 }
 0x13a   : > { %v585_v35 = vadd.f32 %v584_v33, %v4080_v41 }
 0x13b   : > { %v1170_v10 = vadd.f32 %v1098_v23, %v895_v46  ;;  %v4386_v23 = vld [vmem:[%s3712_s28 + $0x180] sm:$0xff] }
 0x13c   : > { %v1375_v37 = vpop.f32.mrf.mxu0  ;;  %3112 = vmatmul.msk.f32.gmra.mxu1 %vm222_vm0, %v4335_v11 }
 0x13d   : > { %v4371_v28 = vadd.f32 %v1372_v8, %v1170_v10  ;;  %3144 = vmatmul.msk.f32.gmra.mxu2 %vm222_vm0, %v4366_v9  ;;  %v4383_v8 = vld [vmem:[%s3712_s28 + $0x16a] sm:$0xff] }
 0x13e   : > { %3208 = vmatmul.msk.f32.gmra.mxu3 %vm222_vm0, %v4369_v19  ;;  %5138 = vst [vmem:[#allocation51_spill] sm:$0xff] %v4383_v8 }
 0x13f   : > { %5137 = vst [vmem:[#allocation50_spill] sm:$0xff] %v4371_v28  ;;  %3272 = vmatmul.msk.f32.gmra.mxu0 %vm222_vm0, %v3861_v39  ;;  %v4389_v28 = vld [vmem:[%s3712_s28 + $0x181] sm:$0xff] }
 0x140   : > { %v826_v42 = vpop.f32.mrf.mxu2 }
 0x141   : > { %v896_v3 = vadd.f32 %v826_v42, %v585_v35  ;;  %v1101_v30 = vpop.f32.mrf.mxu3  ;;  %v587_v25 = vpop.f32.mrf.mxu1 }
 0x142   : > { %v588_v39 = vadd.f32 %v587_v25, %v4102_v43 }
 0x143   : > { %v1171_v46 = vadd.f32 %v1101_v30, %v896_v3  ;;  %v4406_v30 = vld [vmem:[%s3712_s28 + $0x188] sm:$0xff] }
 0x144   : > { %v1378_v10 = vpop.f32.mrf.mxu0  ;;  %3113 = vmatmul.msk.f32.gmra.mxu1 %vm222_vm0, %v4352_v15 }
 0x145   : > { %v4391_v9 = vadd.f32 %v1375_v37, %v1171_v46  ;;  %3145 = vmatmul.msk.f32.gmra.mxu2 %vm222_vm0, %v4383_v8  ;;  %v4403_v37 = vld [vmem:[%s3712_s28 + $0x172] sm:$0xff] }
 0x146   : > { %3209 = vmatmul.msk.f32.gmra.mxu3 %vm222_vm0, %v4386_v23 }
 0x147   : > { %5139 = vst [vmem:[#allocation52_spill] sm:$0xff] %v4391_v9  ;;  %3273 = vmatmul.msk.f32.gmra.mxu0 %vm222_vm0, %v4389_v28  ;;  %v4409_v9 = vld [vmem:[%s3712_s28 + $0x189] sm:$0xff] }
 0x148   : > { %v829_v41 = vpop.f32.mrf.mxu2 }
 0x149   : > { %v897_v33 = vadd.f32 %v829_v41, %v588_v39  ;;  %v1104_v35 = vpop.f32.mrf.mxu3  ;;  %v590_v42 = vpop.f32.mrf.mxu1 }
 0x14a   : > { %v591_v43 = vadd.f32 %v590_v42, %v4124_v20 }
 0x14b   : > { %v1172_v3 = vadd.f32 %v1104_v35, %v897_v33 }
 0x14c   : > { %v1381_v46 = vpop.f32.mrf.mxu0  ;;  %3114 = vmatmul.msk.f32.gmra.mxu1 %vm222_vm0, %v4369_v19 }
 0x14d   : > { %v4411_v8 = vadd.f32 %v1378_v10, %v1172_v3  ;;  %3146 = vmatmul.msk.f32.gmra.mxu2 %vm222_vm0, %v4403_v37 }
 0x14e   : > { %3210 = vmatmul.msk.f32.gmra.mxu3 %vm222_vm0, %v4406_v30 }
 0x14f   : > { %3274 = vmatmul.msk.f32.gmra.mxu0 %vm222_vm0, %v4409_v9 }
 0x150   : > { %v832_v25 = vpop.f32.mrf.mxu2 }
 0x151   : > { %v898_v39 = vadd.f32 %v832_v25, %v591_v43  ;;  %v1107_v41 = vpop.f32.mrf.mxu3  ;;  %v593_v33 = vpop.f32.mrf.mxu1 }
 0x152   : > { %v594_v20 = vadd.f32 %v593_v33, %v3988_v63 }
 0x153   : > { %v1173_v10 = vadd.f32 %v1107_v41, %v898_v39 }
 0x154   : > { %v1384_v35 = vpop.f32.mrf.mxu0  ;;  %3307 = vmatmul.msk.f32.vlgmr.msra.gmra.mxu1 %vm222_vm0, %v3889_v47 }
 0x155   : > { %v4422_v3 = vadd.f32 %v1381_v46, %v1173_v10  ;;  %3371 = vmatmul.msk.f32.vlgmr.msra.gmra.mxu2 %vm222_vm0, %v3892_v48 }
 0x156   : > { %3435 = vmatmul.msk.f32.vlgmr.msra.gmra.mxu3 %vm222_vm0, %v3792_v24 }
 0x157   : > { %3499 = vmatmul.msk.f32.vlgmr.msra.gmra.mxu0 %vm222_vm0, %v3915_v51 }
 0x158   : > { %v835_v42 = vpop.f32.mrf.mxu2 }
 0x159   : > { %v899_v43 = vadd.f32 %v835_v42, %v594_v20  ;;  %v1110_v25 = vpop.f32.mrf.mxu3  ;;  %v596_v39 = vpop.f32.mrf.mxu1 }
 0x15a   : > { %v597_v24 = vadd.f32 %v596_v39, %v4010_v5 }
 0x15b   : > { %v1174_v46 = vadd.f32 %v1110_v25, %v899_v43 }
 0x15c   : > { %v1387_v41 = vpop.f32.mrf.mxu0  ;;  %3308 = vmatmul.msk.f32.gmra.mxu1 %vm222_vm0, %v3902_v49 }
 0x15d   : > { %v4433_v10 = vadd.f32 %v1384_v35, %v1174_v46  ;;  %3372 = vmatmul.msk.f32.gmra.mxu2 %vm222_vm0, %v3905_v50 }
 0x15e   : > { %3436 = vmatmul.msk.f32.gmra.mxu3 %vm222_vm0, %v3821_v31 }
 0x15f   : > { %3500 = vmatmul.msk.f32.gmra.mxu0 %vm222_vm0, %v3929_v53 }
 0x160   : > { %v838_v47 = vpop.f32.mrf.mxu2 }
 0x161   : > { %v900_v48 = vadd.f32 %v838_v47, %v597_v24  ;;  %v1113_v63 = vpop.f32.mrf.mxu3  ;;  %v599_v33 = vpop.f32.mrf.mxu1  ;;  %v3407_v47 = vld [vmem:[%s3712_s28 + $0x61] sm:$0xff] }
 0x162   : > { %v600_v31 = vadd.f32 %v599_v33, %v4032_v17 }
 0x163   : > { %v1175_v35 = vadd.f32 %v1113_v63, %v900_v48 }
 0x164   : > { %v1390_v20 = vpop.f32.mrf.mxu0  ;;  %3309 = vmatmul.msk.f32.gmra.mxu1 %vm222_vm0, %v3915_v51 }
 0x165   : > { %v4444_v42 = vadd.f32 %v1387_v41, %v1175_v35  ;;  %3373 = vmatmul.msk.f32.gmra.mxu2 %vm222_vm0, %v3918_v52 }
 0x166   : > { %3437 = vmatmul.msk.f32.gmra.mxu3 %vm222_vm0, %v3844_v36 }
 0x167   : > { %3501 = vmatmul.msk.f32.gmra.mxu0 %vm222_vm0, %v3943_v55 }
 0x168   : > { %v841_v49 = vpop.f32.mrf.mxu2 }
 0x169   : > { %v901_v50 = vadd.f32 %v841_v49, %v600_v31  ;;  %v1116_v5 = vpop.f32.mrf.mxu3  ;;  %v602_v43 = vpop.f32.mrf.mxu1  ;;  %v3408_v31 = vld [vmem:[%s3712_s28 + $0x69] sm:$0xff] }
 0x16a   : > { %v603_v36 = vadd.f32 %v602_v43, %v4054_v21 }
 0x16b   : > { %v1176_v25 = vadd.f32 %v1116_v5, %v901_v50  ;;  %v5143_v5 = vld [vmem:[#allocation27_spill] sm:$0xff] }
 0x16c   : > { %v1393_v39 = vpop.f32.mrf.mxu0  ;;  %3310 = vmatmul.msk.f32.gmra.mxu1 %vm222_vm0, %v3929_v53 }
 0x16d   : > { %v4455_v46 = vadd.f32 %v1390_v20, %v1176_v25  ;;  %3374 = vmatmul.msk.f32.gmra.mxu2 %vm222_vm0, %v3932_v54 }
 0x16e   : > { %3438 = vmatmul.msk.f32.gmra.mxu3 %vm222_vm0, %v3864_v40  ;;  %v5140_v40 = vld [vmem:[#allocation23_spill] sm:$0xff] }
 0x16f   : > { %3502 = vmatmul.msk.f32.gmra.mxu0 %vm222_vm0, %v3957_v57 }
 0x170   : > { %v844_v51 = vpop.f32.mrf.mxu2 }
 0x171   : > { %v902_v52 = vadd.f32 %v844_v51, %v603_v36  ;;  %v1119_v17 = vpop.f32.mrf.mxu3  ;;  %v605_v41 = vpop.f32.mrf.mxu1 }
 0x172   : > { %v606_v54 = vadd.f32 %v605_v41, %v5140_v40 }
 0x173   : > { %v1177_v24 = vadd.f32 %v1119_v17, %v902_v52  ;;  %v3409_v17 = vld [vmem:[%s3712_s28 + $0x79] sm:$0xff] }
 0x174   : > { %v1396_v48 = vpop.f32.mrf.mxu0  ;;  %3311 = vmatmul.msk.f32.gmra.mxu1 %vm222_vm0, %v3943_v55  ;;  %v5141_v55 = vld [vmem:[#allocation9_spill] sm:$0xff] }
 0x175   : > { %v4467_v53 = vadd.f32 %v1393_v39, %v1177_v24  ;;  %3375 = vmatmul.msk.f32.gmra.mxu2 %vm222_vm0, %v3946_v56  ;;  %v5142_v56 = vld [vmem:[#allocation12_spill] sm:$0xff] }
 0x176   : > { %3439 = vmatmul.msk.f32.gmra.mxu3 %vm222_vm0, %v3407_v47  ;;  %v5145_v47 = vld [vmem:[#allocation15_spill] sm:$0xff] }
 0x177   : > { %3503 = vmatmul.msk.f32.gmra.mxu0 %vm222_vm0, %v3973_v60 }
 0x178   : > { %v847_v21 = vpop.f32.mrf.mxu2 }
 0x179   : > { %v903_v63 = vadd.f32 %v847_v21, %v606_v54  ;;  %v1122_v33 = vpop.f32.mrf.mxu3  ;;  %v608_v35 = vpop.f32.mrf.mxu1 }
 0x17a   : > { %v609_v43 = vadd.f32 %v608_v35, %v5143_v5  ;;  %v5149_v5 = vld [vmem:[#allocation34_spill] sm:$0xff] }
 0x17b   : > { %v1178_v20 = vadd.f32 %v1122_v33, %v903_v63 }
 0x17c   : > { %v1399_v49 = vpop.f32.mrf.mxu0  ;;  %3312 = vmatmul.msk.f32.gmra.mxu1 %vm222_vm0, %v3957_v57  ;;  %v5144_v57 = vld [vmem:[#allocation10_spill] sm:$0xff] }
 0x17d   : > { %v4478_v50 = vadd.f32 %v1396_v48, %v1178_v20  ;;  %3376 = vmatmul.msk.f32.gmra.mxu2 %vm222_vm0, %v5141_v55  ;;  %v5146_v48 = vld [vmem:[#allocation31_spill] sm:$0xff]  ;;  %v3410_v20 = vld [vmem:[%s3712_s28 + $0x81] sm:$0xff]  ;;  %v5148_v55 = vld [vmem:[#allocation18_spill] sm:$0xff] }
 0x17e   : > { %3440 = vmatmul.msk.f32.gmra.mxu3 %vm222_vm0, %v3408_v31 }
 0x17f   : > { %3504 = vmatmul.msk.f32.gmra.mxu0 %vm222_vm0, %v5142_v56 }
 0x180   : > { %v850_v25 = vpop.f32.mrf.mxu2 }
 0x181   : > { %v904_v39 = vadd.f32 %v850_v25, %v609_v43  ;;  %v1125_v36 = vpop.f32.mrf.mxu3  ;;  %v611_v51 = vpop.f32.mrf.mxu1 }
 0x182   : > { %v612_v40 = vadd.f32 %v611_v51, %v5146_v48  ;;  %v5151_v48 = vld [vmem:[#allocation21_spill] sm:$0xff] }
 0x183   : > { %v1179_v52 = vadd.f32 %v1125_v36, %v904_v39 }
 0x184   : > { %v1402_v41 = vpop.f32.mrf.mxu0  ;;  %3313 = vmatmul.msk.f32.gmra.mxu1 %vm222_vm0, %v3973_v60  ;;  %v5147_v60 = vld [vmem:[#allocation13_spill] sm:$0xff] }
 0x185   : > { %v4489_v24 = vadd.f32 %v1399_v49, %v1179_v52  ;;  %3377 = vmatmul.msk.f32.gmra.mxu2 %vm222_vm0, %v5144_v57 }
 0x186   : > { %3441 = vmatmul.msk.f32.gmra.mxu3 %vm222_vm0, %v3409_v17  ;;  %v3411_v17 = vld [vmem:[%s3712_s28 + $0x91] sm:$0xff] }
 0x187   : > { %3505 = vmatmul.msk.f32.gmra.mxu0 %vm222_vm0, %v5145_v47 }
 0x188   : > { %v853_v54 = vpop.f32.mrf.mxu2 }
 0x189   : > { %v905_v21 = vadd.f32 %v853_v54, %v612_v40  ;;  %v1128_v63 = vpop.f32.mrf.mxu3  ;;  %v614_v33 = vpop.f32.mrf.mxu1  ;;  %v5152_v40 = vld [vmem:[#allocation11_spill] sm:$0xff] }
 0x18a   : > { %v615_v43 = vadd.f32 %v614_v33, %v5149_v5 }
 0x18b   : > { %v1180_v35 = vadd.f32 %v1128_v63, %v905_v21 }
 0x18c   : > { %v1405_v31 = vpop.f32.mrf.mxu0  ;;  %3314 = vmatmul.msk.f32.gmra.mxu1 %vm222_vm0, %v5142_v56  ;;  %v5150_v56 = vld [vmem:[#allocation16_spill] sm:$0xff] }
 0x18d   : > { %v4500_v49 = vadd.f32 %v1402_v41, %v1180_v35  ;;  %3378 = vmatmul.msk.f32.gmra.mxu2 %vm222_vm0, %v5147_v60 }
 0x18e   : > { %3442 = vmatmul.msk.f32.gmra.mxu3 %vm222_vm0, %v3410_v20 }
 0x18f   : > { %3506 = vmatmul.msk.f32.gmra.mxu0 %vm222_vm0, %v5148_v55 }
 0x190   : > { %v856_v25 = vpop.f32.mrf.mxu2 }
 0x191   : > { %v906_v39 = vadd.f32 %v856_v25, %v615_v43  ;;  %v1131_v36 = vpop.f32.mrf.mxu3  ;;  %v617_v51 = vpop.f32.mrf.mxu1  ;;  %v5154_v43 = vld [vmem:[#allocation25_spill] sm:$0xff]  ;;  %v5155_v25 = vld [vmem:[#allocation14_spill] sm:$0xff] }
 0x192   : > { %v618_v54 = vadd.f32 %v617_v51, %v5152_v40 }
 0x193   : > { %v1181_v52 = vadd.f32 %v1131_v36, %v906_v39 }
 0x194   : > { %v1408_v41 = vpop.f32.mrf.mxu0  ;;  %3315 = vmatmul.msk.f32.gmra.mxu1 %vm222_vm0, %v5145_v47  ;;  %v5153_v47 = vld [vmem:[#allocation19_spill] sm:$0xff] }
 0x195   : > { %v4511_v57 = vadd.f32 %v1405_v31, %v1181_v52  ;;  %3379 = vmatmul.msk.f32.gmra.mxu2 %vm222_vm0, %v5150_v56  ;;  %v3412_v31 = vld [vmem:[%s3712_s28 + $0x99] sm:$0xff]  ;;  %v3413_v56 = vld [vmem:[%s3712_s28 + $0xa9] sm:$0xff] }
 0x196   : > { %3443 = vmatmul.msk.f32.gmra.mxu3 %vm222_vm0, %v3411_v17 }
 0x197   : > { %3507 = vmatmul.msk.f32.gmra.mxu0 %vm222_vm0, %v5151_v48 }
 0x198   : > { %v859_v21 = vpop.f32.mrf.mxu2 }
 0x199   : > { %v907_v63 = vadd.f32 %v859_v21, %v618_v54  ;;  %v1134_v33 = vpop.f32.mrf.mxu3  ;;  %v620_v35 = vpop.f32.mrf.mxu1  ;;  %v5157_v21 = vld [vmem:[#allocation29_spill] sm:$0xff] }
 0x19a   : > { %v621_v39 = vadd.f32 %v620_v35, %v5155_v25  ;;  %v3414_v25 = vld [vmem:[%s3712_s28 + $0xb1] sm:$0xff] }
 0x19b   : > { %v1182_v20 = vadd.f32 %v1134_v33, %v907_v63  ;;  %v5158_v63 = vld [vmem:[#allocation17_spill] sm:$0xff] }
 0x19c   : > { %v1411_v60 = vpop.f32.mrf.mxu0  ;;  %3316 = vmatmul.msk.f32.gmra.mxu1 %vm222_vm0, %v5148_v55  ;;  %v5156_v55 = vld [vmem:[#allocation22_spill] sm:$0xff] }
 0x19d   : > { %v4522_v5 = vadd.f32 %v1408_v41, %v1182_v20  ;;  %3380 = vmatmul.msk.f32.gmra.mxu2 %vm222_vm0, %v5153_v47 }
 0x19e   : > { %3444 = vmatmul.msk.f32.gmra.mxu3 %vm222_vm0, %v3412_v31 }
 0x19f   : > { %3508 = vmatmul.msk.f32.gmra.mxu0 %vm222_vm0, %v5154_v43 }
 0x1a0   : > { %v862_v36 = vpop.f32.mrf.mxu2 }
 0x1a1   : > { %v908_v51 = vadd.f32 %v862_v36, %v621_v39  ;;  %v1137_v52 = vpop.f32.mrf.mxu3  ;;  %v623_v17 = vpop.f32.mrf.mxu1 }
 0x1a2   : > { %v624_v33 = vadd.f32 %v623_v17, %v5158_v63 }
 0x1a3   : > { %v1183_v41 = vadd.f32 %v1137_v52, %v908_v51  ;;  %v5160_v51 = vld [vmem:[#allocation33_spill] sm:$0xff]  ;;  %v5161_v52 = vld [vmem:[#allocation20_spill] sm:$0xff] }
 0x1a4   : > { %v1414_v40 = vpop.f32.mrf.mxu0  ;;  %3317 = vmatmul.msk.f32.gmra.mxu1 %vm222_vm0, %v5151_v48  ;;  %v5159_v48 = vld [vmem:[#allocation26_spill] sm:$0xff] }
 0x1a5   : > { %v4533_v54 = vadd.f32 %v1411_v60, %v1183_v41  ;;  %3381 = vmatmul.msk.f32.gmra.mxu2 %vm222_vm0, %v5156_v55 }
 0x1a6   : > { %3445 = vmatmul.msk.f32.gmra.mxu3 %vm222_vm0, %v3413_v56 }
 0x1a7   : > { %3509 = vmatmul.msk.f32.gmra.mxu0 %vm222_vm0, %v5157_v21 }
 0x1a8   : > { %v865_v35 = vpop.f32.mrf.mxu2 }
 0x1a9   : > { %v909_v20 = vadd.f32 %v865_v35, %v624_v33  ;;  %v1140_v31 = vpop.f32.mrf.mxu3  ;;  %v626_v47 = vpop.f32.mrf.mxu1  ;;  %v3415_v33 = vld [vmem:[%s3712_s28 + $0xc1] sm:$0xff] }
 0x1aa   : > { %v627_v17 = vadd.f32 %v626_v47, %v5161_v52  ;;  %v5164_v47 = vld [vmem:[#allocation24_spill] sm:$0xff] }
 0x1ab   : > { %v1184_v60 = vadd.f32 %v1140_v31, %v909_v20  ;;  %v5163_v31 = vld [vmem:[#allocation36_spill] sm:$0xff] }
 0x1ac   : > { %v1417_v39 = vpop.f32.mrf.mxu0  ;;  %3318 = vmatmul.msk.f32.gmra.mxu1 %vm222_vm0, %v5154_v43  ;;  %v5162_v43 = vld [vmem:[#allocation30_spill] sm:$0xff] }
 0x1ad   : > { %v4544_v36 = vadd.f32 %v1414_v40, %v1184_v60  ;;  %3382 = vmatmul.msk.f32.gmra.mxu2 %vm222_vm0, %v5159_v48 }
 0x1ae   : > { %3446 = vmatmul.msk.f32.gmra.mxu3 %vm222_vm0, %v3414_v25 }
 0x1af   : > { %3510 = vmatmul.msk.f32.gmra.mxu0 %vm222_vm0, %v5160_v51 }
 0x1b0   : > { %v868_v41 = vpop.f32.mrf.mxu2 }
 0x1b1   : > { %v910_v56 = vadd.f32 %v868_v41, %v627_v17  ;;  %v1143_v55 = vpop.f32.mrf.mxu3  ;;  %v629_v63 = vpop.f32.mrf.mxu1  ;;  %v3416_v41 = vld [vmem:[%s3712_s28 + $0xc9] sm:$0xff] }
 0x1b2   : > { %v630_v60 = vadd.f32 %v629_v63, %v5164_v47 }
 0x1b3   : > { %v1185_v40 = vadd.f32 %v1143_v55, %v910_v56 }
 0x1b4   : > { %v1420_v35 = vpop.f32.mrf.mxu0  ;;  %3319 = vmatmul.msk.f32.gmra.mxu1 %vm222_vm0, %v5157_v21  ;;  %v5165_v21 = vld [vmem:[#allocation28_spill] sm:$0xff] }
 0x1b5   : > { %v4555_v20 = vadd.f32 %v1417_v39, %v1185_v40  ;;  %3383 = vmatmul.msk.f32.gmra.mxu2 %vm222_vm0, %v5162_v43 }
 0x1b6   : > { %3447 = vmatmul.msk.f32.gmra.mxu3 %vm222_vm0, %v3415_v33 }
 0x1b7   : > { %3511 = vmatmul.msk.f32.gmra.mxu0 %vm222_vm0, %v5163_v31 }
 0x1b8   : > { %v871_v25 = vpop.f32.mrf.mxu2 }
 0x1b9   : > { %v911_v48 = vadd.f32 %v871_v25, %v630_v60  ;;  %v1146_v52 = vpop.f32.mrf.mxu3  ;;  %v632_v17 = vpop.f32.mrf.mxu1  ;;  %v3417_v60 = vld [vmem:[%s3712_s28 + $0xd9] sm:$0xff] }
 0x1ba   : > { %v633_v63 = vadd.f32 %v632_v17, %v5165_v21  ;;  %v3418_v21 = vld [vmem:[%s3712_s28 + $0xe1] sm:$0xff] }
 0x1bb   : > { %v1186_v39 = vadd.f32 %v1146_v52, %v911_v48 }
 0x1bc   : > { %v1423_v56 = vpop.f32.mrf.mxu0  ;;  %3320 = vmatmul.msk.f32.gmra.mxu1 %vm222_vm0, %v5160_v51 }
 0x1bd   : > { %v4566_v55 = vadd.f32 %v1420_v35, %v1186_v39  ;;  %3384 = vmatmul.msk.f32.gmra.mxu2 %vm222_vm0, %v4130_v44  ;;  %v5166_v44 = vld [vmem:[#allocation32_spill] sm:$0xff] }
 0x1be   : > { %3448 = vmatmul.msk.f32.gmra.mxu3 %vm222_vm0, %v3416_v41 }
 0x1bf   : > { %3512 = vmatmul.msk.f32.gmra.mxu0 %vm222_vm0, %v4162_v2 }
 0x1c0   : > { %v874_v40 = vpop.f32.mrf.mxu2 }
 0x1c1   : > { %v912_v33 = vadd.f32 %v874_v40, %v633_v63  ;;  %v1149_v43 = vpop.f32.mrf.mxu3  ;;  %v635_v47 = vpop.f32.mrf.mxu1 }
 0x1c2   : > { %v636_v51 = vadd.f32 %v635_v47, %v5166_v44 }
 0x1c3   : > { %v1187_v35 = vadd.f32 %v1149_v43, %v912_v33 }
 0x1c4   : > { %v1426_v25 = vpop.f32.mrf.mxu0  ;;  %3321 = vmatmul.msk.f32.gmra.mxu1 %vm222_vm0, %v5163_v31 }
 0x1c5   : > { %v4577_v48 = vadd.f32 %v1423_v56, %v1187_v35  ;;  %3385 = vmatmul.msk.f32.gmra.mxu2 %vm222_vm0, %v4150_v61  ;;  %v5167_v61 = vld [vmem:[#allocation35_spill] sm:$0xff] }
 0x1c6   : > { %3449 = vmatmul.msk.f32.gmra.mxu3 %vm222_vm0, %v3417_v60 }
 0x1c7   : > { %3513 = vmatmul.msk.f32.gmra.mxu0 %vm222_vm0, %v4179_v27 }
 0x1c8   : > { %v877_v52 = vpop.f32.mrf.mxu2 }
 0x1c9   : > { %v913_v17 = vadd.f32 %v877_v52, %v636_v51  ;;  %v1152_v39 = vpop.f32.mrf.mxu3  ;;  %v638_v41 = vpop.f32.mrf.mxu1 }
 0x1ca   : > { %v639_v31 = vadd.f32 %v638_v41, %v5167_v61 }
 0x1cb   : > { %v1188_v56 = vadd.f32 %v1152_v39, %v913_v17 }
 0x1cc   : > { %v1429_v63 = vpop.f32.mrf.mxu0  ;;  %3322 = vmatmul.msk.f32.gmra.mxu1 %vm222_vm0, %v4162_v2 }
 0x1cd   : > { %v4588_v40 = vadd.f32 %v1426_v25, %v1188_v56  ;;  %3386 = vmatmul.msk.f32.gmra.mxu2 %vm222_vm0, %v4165_v58  ;;  %v3419_v25 = vld [vmem:[%s3712_s28 + $0xf1] sm:$0xff]  ;;  %v5168_v58 = vld [vmem:[#allocation37_spill] sm:$0xff] }
 0x1ce   : > { %3450 = vmatmul.msk.f32.gmra.mxu3 %vm222_vm0, %v3418_v21  ;;  %v3420_v21 = vld [vmem:[%s3712_s28 + $0xf9] sm:$0xff] }
 0x1cf   : > { %3514 = vmatmul.msk.f32.gmra.mxu0 %vm222_vm0, %v4196_v62 }
 0x1d0   : > { %v880_v33 = vpop.f32.mrf.mxu2 }
 0x1d1   : > { %v914_v43 = vadd.f32 %v880_v33, %v639_v31  ;;  %v1155_v47 = vpop.f32.mrf.mxu3  ;;  %v1610_v35 = vpop.f32.mrf.mxu1 }
 0x1d2   : > { %v1706_v2 = vadd.f32 %v1610_v35, %v5168_v58 }
 0x1d3   : > { %v1189_v60 = vadd.f32 %v1155_v47, %v914_v43 }
 0x1d4   : > { %v2433_v44 = vpop.f32.mrf.mxu0  ;;  %3323 = vmatmul.msk.f32.gmra.mxu1 %vm222_vm0, %v4179_v27  ;;  %v5169_v27 = vld [vmem:[#allocation38_spill] sm:$0xff] }
 0x1d5   : > { %v4599_v51 = vadd.f32 %v1429_v63, %v1189_v60  ;;  %3387 = vmatmul.msk.f32.gmra.mxu2 %vm222_vm0, %v4182_v6  ;;  %v3421_v60 = vld [vmem:[%s3712_s28 + $0x109] sm:$0xff] }
 0x1d6   : > { %3451 = vmatmul.msk.f32.gmra.mxu3 %vm222_vm0, %v3419_v25 }
 0x1d7   : > { %3515 = vmatmul.msk.f32.gmra.mxu0 %vm222_vm0, %v4213_v4 }
 0x1d8   : > { %v1885_v52 = vpop.f32.mrf.mxu2 }
 0x1d9   : > { %v1981_v17 = vadd.f32 %v1885_v52, %v1706_v2  ;;  %v2159_v39 = vpop.f32.mrf.mxu3  ;;  %v1613_v41 = vpop.f32.mrf.mxu1 }
 0x1da   : > { %v1707_v6 = vadd.f32 %v1613_v41, %v5169_v27 }
 0x1db   : > { %v2255_v56 = vadd.f32 %v2159_v39, %v1981_v17 }
 0x1dc   : > { %v2436_v63 = vpop.f32.mrf.mxu0  ;;  %3324 = vmatmul.msk.f32.gmra.mxu1 %vm222_vm0, %v4196_v62 }
 0x1dd   : > { %v2529_v61 = vadd.f32 %v2433_v44, %v2255_v56  ;;  %3388 = vmatmul.msk.f32.gmra.mxu2 %vm222_vm0, %v4199_v13  ;;  %v5170_v13 = vld [vmem:[#allocation39_spill] sm:$0xff] }
 0x1de   : > { %3452 = vmatmul.msk.f32.gmra.mxu3 %vm222_vm0, %v3420_v21 }
 0x1df   : > { %3516 = vmatmul.msk.f32.gmra.mxu0 %vm222_vm0, %v4230_v16  ;;  %v2561_v62 = vmax.f32 %v2529_v61, 0.0 }
 0x1e0   : > { %v1888_v31 = vpop.f32.mrf.mxu2 }
 0x1e1   : > { %v1982_v33 = vadd.f32 %v1888_v31, %v1707_v6  ;;  %v2162_v43 = vpop.f32.mrf.mxu3  ;;  %v1616_v47 = vpop.f32.mrf.mxu1 }
 0x1e2   : > { %v1708_v58 = vadd.f32 %v1616_v47, %v5170_v13 }
 0x1e3   : > { %v2256_v35 = vadd.f32 %v2162_v43, %v1982_v33 }
 0x1e4   : > { %v2439_v25 = vpop.f32.mrf.mxu0  ;;  %3325 = vmatmul.msk.f32.gmra.mxu1 %vm222_vm0, %v4213_v4  ;;  %v3422_v4 = vld [vmem:[%s3712_s28 + $0x111] sm:$0xff] }
 0x1e5   : > { %v2530_v44 = vadd.f32 %v2436_v63, %v2256_v35  ;;  %3389 = vmatmul.msk.f32.gmra.mxu2 %vm222_vm0, %v4216_v14  ;;  %v5171_v14 = vld [vmem:[#allocation40_spill] sm:$0xff] }
 0x1e6   : > { %3453 = vmatmul.msk.f32.gmra.mxu3 %vm222_vm0, %v3421_v60 }
 0x1e7   : > { %3517 = vmatmul.msk.f32.gmra.mxu0 %vm222_vm0, %v4247_v32  ;;  %v2562_v2 = vmax.f32 %v2530_v44, 0.0 }
 0x1e8   : > { %v1891_v52 = vpop.f32.mrf.mxu2 }
 0x1e9   : > { %v2593_v17 = vadd.f32 %v2562_v2, %v2561_v62  ;;  %v1983_v39 = vadd.f32 %v1891_v52, %v1708_v58  ;;  %v2165_v41 = vpop.f32.mrf.mxu3  ;;  %v1619_v56 = vpop.f32.mrf.mxu1 }
 0x1ea   : > { %v1709_v61 = vadd.f32 %v1619_v56, %v5171_v14  ;;  %v3424_v56 = vld [vmem:[%s3712_s28 + $0x129] sm:$0xff] }
 0x1eb   : > { %v2257_v21 = vadd.f32 %v2165_v41, %v1983_v39 }
 0x1ec   : > { %v2442_v63 = vpop.f32.mrf.mxu0  ;;  %3326 = vmatmul.msk.f32.gmra.mxu1 %vm222_vm0, %v4230_v16 }
 0x1ed   : > { %v2531_v27 = vadd.f32 %v2439_v25, %v2257_v21  ;;  %3390 = vmatmul.msk.f32.gmra.mxu2 %vm222_vm0, %v4233_v18  ;;  %v3423_v25 = vld [vmem:[%s3712_s28 + $0x121] sm:$0xff] }
 0x1ee   : > { %3454 = vmatmul.msk.f32.gmra.mxu3 %vm222_vm0, %v3422_v4  ;;  %v5172_v18 = vld [vmem:[#allocation41_spill] sm:$0xff] }
 0x1ef   : > { %3518 = vmatmul.msk.f32.gmra.mxu0 %vm222_vm0, %v4264_v45  ;;  %v2563_v6 = vmax.f32 %v2531_v27, 0.0 }
 0x1f0   : > { %v1894_v31 = vpop.f32.mrf.mxu2 }
 0x1f1   : > { %v2594_v33 = vadd.f32 %v2593_v17, %v2563_v6  ;;  %v1984_v43 = vadd.f32 %v1894_v31, %v1709_v61  ;;  %v2168_v47 = vpop.f32.mrf.mxu3  ;;  %v1622_v35 = vpop.f32.mrf.mxu1 }
 0x1f2   : > { %v1710_v62 = vadd.f32 %v1622_v35, %v5172_v18 }
 0x1f3   : > { %v2258_v60 = vadd.f32 %v2168_v47, %v1984_v43  ;;  %v3425_v43 = vld [vmem:[%s3712_s28 + $0x139] sm:$0xff] }
 0x1f4   : > { %v2445_v16 = vpop.f32.mrf.mxu0  ;;  %3327 = vmatmul.msk.f32.gmra.mxu1 %vm222_vm0, %v4247_v32 }
 0x1f5   : > { %v2532_v44 = vadd.f32 %v2442_v63, %v2258_v60  ;;  %3391 = vmatmul.msk.f32.gmra.mxu2 %vm222_vm0, %v4250_v22  ;;  %v5173_v22 = vld [vmem:[#allocation42_spill] sm:$0xff] }
 0x1f6   : > { %3455 = vmatmul.msk.f32.gmra.mxu3 %vm222_vm0, %v3423_v25 }
 0x1f7   : > { %3519 = vmatmul.msk.f32.gmra.mxu0 %vm222_vm0, %v4281_v0  ;;  %v2564_v13 = vmax.f32 %v2532_v44, 0.0 }
 0x1f8   : > { %v1897_v58 = vpop.f32.mrf.mxu2 }
 0x1f9   : > { %v2595_v2 = vadd.f32 %v2594_v33, %v2564_v13  ;;  %v1985_v52 = vadd.f32 %v1897_v58, %v1710_v62  ;;  %v2171_v17 = vpop.f32.mrf.mxu3  ;;  %v1625_v39 = vpop.f32.mrf.mxu1  ;;  %v3426_v58 = vld [vmem:[%s3712_s28 + $0x141] sm:$0xff] }
 0x1fa   : > { %v1711_v4 = vadd.f32 %v1625_v39, %v5173_v22  ;;  %v5176_v22 = vld [vmem:[#allocation45_spill] sm:$0xff] }
 0x1fb   : > { %v2259_v41 = vadd.f32 %v2171_v17, %v1985_v52 }
 0x1fc   : > { %v2448_v32 = vpop.f32.mrf.mxu0  ;;  %3328 = vmatmul.msk.f32.gmra.mxu1 %vm222_vm0, %v4264_v45 }
 0x1fd   : > { %v2533_v21 = vadd.f32 %v2445_v16, %v2259_v41  ;;  %3392 = vmatmul.msk.f32.gmra.mxu2 %vm222_vm0, %v4267_v29  ;;  %v5174_v29 = vld [vmem:[#allocation43_spill] sm:$0xff] }
 0x1fe   : > { %3456 = vmatmul.msk.f32.gmra.mxu3 %vm222_vm0, %v3424_v56 }
 0x1ff   : > { %3520 = vmatmul.msk.f32.gmra.mxu0 %vm222_vm0, %v4298_v26  ;;  %v2565_v63 = vmax.f32 %v2533_v21, 0.0 }
 0x200   : > { %v1900_v27 = vpop.f32.mrf.mxu2 }
 0x201   : > { %v2596_v14 = vadd.f32 %v2595_v2, %v2565_v63  ;;  %v1986_v61 = vadd.f32 %v1900_v27, %v1711_v4  ;;  %v2174_v6 = vpop.f32.mrf.mxu3  ;;  %v1628_v31 = vpop.f32.mrf.mxu1 }
 0x202   : > { %v1712_v35 = vadd.f32 %v1628_v31, %v5174_v29 }
 0x203   : > { %v2260_v33 = vadd.f32 %v2174_v6, %v1986_v61 }
 0x204   : > { %v2451_v45 = vpop.f32.mrf.mxu0  ;;  %3329 = vmatmul.msk.f32.gmra.mxu1 %vm222_vm0, %v4281_v0 }
 0x205   : > { %v2534_v47 = vadd.f32 %v2448_v32, %v2260_v33  ;;  %3393 = vmatmul.msk.f32.gmra.mxu2 %vm222_vm0, %v4284_v34  ;;  %v5175_v34 = vld [vmem:[#allocation44_spill] sm:$0xff] }
 0x206   : > { %3457 = vmatmul.msk.f32.gmra.mxu3 %vm222_vm0, %v3425_v43 }
 0x207   : > { %3521 = vmatmul.msk.f32.gmra.mxu0 %vm222_vm0, %v4315_v12  ;;  %v2566_v60 = vmax.f32 %v2534_v47, 0.0 }
 0x208   : > { %v1903_v25 = vpop.f32.mrf.mxu2 }
 0x209   : > { %v2597_v16 = vadd.f32 %v2596_v14, %v2566_v60  ;;  %v1987_v44 = vadd.f32 %v1903_v25, %v1712_v35  ;;  %v2177_v18 = vpop.f32.mrf.mxu3  ;;  %v1631_v62 = vpop.f32.mrf.mxu1  ;;  %v3428_v35 = vld [vmem:[%s3712_s28 + $0x159] sm:$0xff] }
 0x20a   : > { %v1713_v52 = vadd.f32 %v1631_v62, %v5175_v34  ;;  %v3429_v34 = vld [vmem:[%s3712_s28 + $0x169] sm:$0xff] }
 0x20b   : > { %v2261_v13 = vadd.f32 %v2177_v18, %v1987_v44 }
 0x20c   : > { %v2454_v0 = vpop.f32.mrf.mxu0  ;;  %3330 = vmatmul.msk.f32.gmra.mxu1 %vm222_vm0, %v4298_v26  ;;  %v3427_v26 = vld [vmem:[%s3712_s28 + $0x151] sm:$0xff] }
 0x20d   : > { %v2535_v2 = vadd.f32 %v2451_v45, %v2261_v13  ;;  %3394 = vmatmul.msk.f32.gmra.mxu2 %vm222_vm0, %v4301_v38  ;;  %v5177_v45 = vld [vmem:[#allocation46_spill] sm:$0xff] }
 0x20e   : > { %3458 = vmatmul.msk.f32.gmra.mxu3 %vm222_vm0, %v3426_v58  ;;  %v5179_v58 = vld [vmem:[#allocation47_spill] sm:$0xff] }
 0x20f   : > { %3522 = vmatmul.msk.f32.gmra.mxu0 %vm222_vm0, %v4332_v59  ;;  %v2567_v17 = vmax.f32 %v2535_v2, 0.0 }
 0x210   : > { %v1906_v39 = vpop.f32.mrf.mxu2 }
 0x211   : > { %v2598_v41 = vadd.f32 %v2597_v16, %v2567_v17  ;;  %v1988_v56 = vadd.f32 %v1906_v39, %v1713_v52  ;;  %v2180_v32 = vpop.f32.mrf.mxu3  ;;  %v1634_v21 = vpop.f32.mrf.mxu1 }
 0x212   : > { %v1714_v4 = vadd.f32 %v1634_v21, %v5176_v22  ;;  %v5181_v22 = vld [vmem:[#allocation48_spill] sm:$0xff] }
 0x213   : > { %v2262_v63 = vadd.f32 %v2180_v32, %v1988_v56 }
 0x214   : > { %v2457_v27 = vpop.f32.mrf.mxu0  ;;  %3331 = vmatmul.msk.f32.gmra.mxu1 %vm222_vm0, %v4315_v12 }
 0x215   : > { %v2536_v38 = vadd.f32 %v2454_v0, %v2262_v63  ;;  %3395 = vmatmul.msk.f32.gmra.mxu2 %vm222_vm0, %v4318_v7  ;;  %v5178_v7 = vld [vmem:[#allocation49_spill] sm:$0xff] }
 0x216   : > { %3459 = vmatmul.msk.f32.gmra.mxu3 %vm222_vm0, %v3427_v26  ;;  %v3430_v26 = vld [vmem:[%s3712_s28 + $0x171] sm:$0xff] }
 0x217   : > { %3523 = vmatmul.msk.f32.gmra.mxu0 %vm222_vm0, %v4349_v1  ;;  %v2568_v14 = vmax.f32 %v2536_v38, 0.0 }
 0x218   : > { %v1909_v61 = vpop.f32.mrf.mxu2 }
 0x219   : > { %v2599_v6 = vadd.f32 %v2598_v41, %v2568_v14  ;;  %v1989_v31 = vadd.f32 %v1909_v61, %v1714_v4  ;;  %v2183_v33 = vpop.f32.mrf.mxu3  ;;  %v1637_v43 = vpop.f32.mrf.mxu1 }
 0x21a   : > { %v1715_v47 = vadd.f32 %v1637_v43, %v5177_v45 }
 0x21b   : > { %v2263_v29 = vadd.f32 %v2183_v33, %v1989_v31  ;;  %v5182_v33 = vld [vmem:[#allocation50_spill] sm:$0xff] }
 0x21c   : > { %v2460_v12 = vpop.f32.mrf.mxu0  ;;  %3332 = vmatmul.msk.f32.gmra.mxu1 %vm222_vm0, %v4332_v59 }
 0x21d   : > { %v2537_v60 = vadd.f32 %v2457_v27, %v2263_v29  ;;  %3396 = vmatmul.msk.f32.gmra.mxu2 %vm222_vm0, %v4335_v11  ;;  %v5180_v11 = vld [vmem:[#allocation51_spill] sm:$0xff]  ;;  %v3495_v29 = vld [vmem:[%s3712_s28 + $0x182] sm:$0xff] }
 0x21e   : > { %3460 = vmatmul.msk.f32.gmra.mxu3 %vm222_vm0, %v3428_v35 }
 0x21f   : > { %3524 = vmatmul.msk.f32.gmra.mxu0 %vm222_vm0, %v5178_v7  ;;  %v2569_v25 = vmax.f32 %v2537_v60, 0.0 }
 0x220   : > { %v1912_v16 = vpop.f32.mrf.mxu2 }
 0x221   : > { %v2600_v44 = vadd.f32 %v2599_v6, %v2569_v25  ;;  %v1990_v18 = vadd.f32 %v1912_v16, %v1715_v47  ;;  %v2186_v62 = vpop.f32.mrf.mxu3  ;;  %v1640_v13 = vpop.f32.mrf.mxu1 }
 0x222   : > { %v1716_v0 = vadd.f32 %v1640_v13, %v5179_v58  ;;  %v3496_v58 = vld [vmem:[%s3712_s28 + $0x18a] sm:$0xff] }
 0x223   : > { %v2264_v2 = vadd.f32 %v2186_v62, %v1990_v18 }
 0x224   : > { %v2463_v59 = vpop.f32.mrf.mxu0  ;;  %3333 = vmatmul.msk.f32.gmra.mxu1 %vm222_vm0, %v4349_v1 }
 0x225   : > { %v2538_v52 = vadd.f32 %v2460_v12, %v2264_v2  ;;  %3397 = vmatmul.msk.f32.gmra.mxu2 %vm222_vm0, %v4352_v15 }
 0x226   : > { %3461 = vmatmul.msk.f32.gmra.mxu3 %vm222_vm0, %v3429_v34 }
 0x227   : > { %3525 = vmatmul.msk.f32.gmra.mxu0 %vm222_vm0, %v5180_v11  ;;  %v2570_v17 = vmax.f32 %v2538_v52, 0.0 }
 0x228   : > { %v1915_v39 = vpop.f32.mrf.mxu2 }
 0x229   : > { %v2601_v41 = vadd.f32 %v2600_v44, %v2570_v17  ;;  %v1991_v56 = vadd.f32 %v1915_v39, %v1716_v0  ;;  %v2189_v32 = vpop.f32.mrf.mxu3  ;;  %v1643_v21 = vpop.f32.mrf.mxu1  ;;  %v5183_v44 = vld [vmem:[#allocation52_spill] sm:$0xff] }
 0x22a   : > { %v1717_v4 = vadd.f32 %v1643_v21, %v5181_v22 }
 0x22b   : > { %v2265_v63 = vadd.f32 %v2189_v32, %v1991_v56 }
 0x22c   : > { %v2466_v1 = vpop.f32.mrf.mxu0  ;;  %3334 = vmatmul.msk.f32.gmra.mxu1 %vm222_vm0, %v5178_v7 }
 0x22d   : > { %v2539_v27 = vadd.f32 %v2463_v59, %v2265_v63  ;;  %3398 = vmatmul.msk.f32.gmra.mxu2 %vm222_vm0, %v4369_v19  ;;  %v3370_v63 = vld [vmem:[%s3712_s28 + $0x1a0] sm:$0xff] }
 0x22e   : > { %3462 = vmatmul.msk.f32.gmra.mxu3 %vm222_vm0, %v3430_v26 }
 0x22f   : > { %3526 = vmatmul.msk.f32.gmra.mxu0 %vm222_vm0, %v4403_v37  ;;  %v2571_v15 = vmax.f32 %v2539_v27, 0.0  ;;  %v3434_v27 = vld [vmem:[%s3712_s28 + $0x1a1] sm:$0xff] }
 0x230   : > { %v1918_v38 = vpop.f32.mrf.mxu2 }
 0x231   : > { %v2602_v14 = vadd.f32 %v2601_v41, %v2571_v15  ;;  %v1992_v61 = vadd.f32 %v1918_v38, %v1717_v4  ;;  %v2192_v6 = vpop.f32.mrf.mxu3  ;;  %v1646_v31 = vpop.f32.mrf.mxu1  ;;  %v3498_v38 = vld [vmem:[%s3712_s28 + $0x1a2] sm:$0xff] }
 0x232   : > { %v1718_v43 = vadd.f32 %v1646_v31, %v5182_v33 }
 0x233   : > { %v2266_v45 = vadd.f32 %v2192_v6, %v1992_v61 }
 0x234   : > { %v2469_v47 = vpop.f32.mrf.mxu0  ;;  %3335 = vmatmul.msk.f32.gmra.mxu1 %vm222_vm0, %v5180_v11  ;;  %v3369_v11 = vld [vmem:[%s3712_s28 + $0x198] sm:$0xff] }
 0x235   : > { %v2540_v35 = vadd.f32 %v2466_v1, %v2266_v45  ;;  %3399 = vmatmul.msk.f32.gmra.mxu2 %vm222_vm0, %v4386_v23 }
 0x236   : > { %3463 = vmatmul.msk.f32.gmra.mxu3 %vm222_vm0, %v4389_v28 }
 0x237   : > { %3527 = vmatmul.msk.f32.gmra.mxu0 %vm222_vm0, %v3495_v29  ;;  %v2572_v19 = vmax.f32 %v2540_v35, 0.0 }
 0x238   : > { %v1921_v12 = vpop.f32.mrf.mxu2 }
 0x239   : > { %v2603_v60 = vadd.f32 %v2602_v14, %v2572_v19  ;;  %v1993_v7 = vadd.f32 %v1921_v12, %v1718_v43  ;;  %v2195_v25 = vpop.f32.mrf.mxu3  ;;  %v1649_v16 = vpop.f32.mrf.mxu1 }
 0x23a   : > { %v1719_v18 = vadd.f32 %v1649_v16, %v5183_v44 }
 0x23b   : > { %v2267_v62 = vadd.f32 %v2195_v25, %v1993_v7 }
 0x23c   : > { %v2472_v13 = vpop.f32.mrf.mxu0  ;;  %3336 = vmatmul.msk.f32.gmra.mxu1 %vm222_vm0, %v4403_v37  ;;  %v3433_v37 = vld [vmem:[%s3712_s28 + $0x199] sm:$0xff] }
 0x23d   : > { %v2541_v0 = vadd.f32 %v2469_v47, %v2267_v62  ;;  %3400 = vmatmul.msk.f32.gmra.mxu2 %vm222_vm0, %v4406_v30  ;;  %v3497_v30 = vld [vmem:[%s3712_s28 + $0x19a] sm:$0xff] }
 0x23e   : > { %3464 = vmatmul.msk.f32.gmra.mxu3 %vm222_vm0, %v4409_v9 }
 0x23f   : > { %3528 = vmatmul.msk.f32.gmra.mxu0 %vm222_vm0, %v3496_v58  ;;  %v2573_v28 = vmax.f32 %v2541_v0, 0.0 }
 0x240   : > { %v1924_v23 = vpop.f32.mrf.mxu2 }
 0x241   : > { %v2604_v2 = vadd.f32 %v2603_v60, %v2573_v28  ;;  %v1994_v34 = vadd.f32 %v1924_v23, %v1719_v18  ;;  %v2198_v59 = vpop.f32.mrf.mxu3  ;;  %v1652_v52 = vpop.f32.mrf.mxu1 }
 0x242   : > { %v1720_v17 = vadd.f32 %v1652_v52, %v4411_v8 }
 0x243   : > { %v2268_v39 = vadd.f32 %v2198_v59, %v1994_v34 }
 0x244   : > { %v2475_v41 = vpop.f32.mrf.mxu0  ;;  %3337 = vmatmul.msk.f32.gmra.mxu1 %vm222_vm0, %v3495_v29 }
 0x245   : > { %v2542_v56 = vadd.f32 %v2472_v13, %v2268_v39  ;;  %3401 = vmatmul.msk.f32.gmra.mxu2 %vm222_vm0, %v3369_v11 }
 0x246   : > { %3465 = vmatmul.msk.f32.gmra.mxu3 %vm222_vm0, %v3433_v37 }
 0x247   : > { %3529 = vmatmul.msk.f32.gmra.mxu0 %vm222_vm0, %v3497_v30  ;;  %v2574_v9 = vmax.f32 %v2542_v56, 0.0 }
 0x248   : > { %v1927_v32 = vpop.f32.mrf.mxu2 }
 0x249   : > { %v2605_v21 = vadd.f32 %v2604_v2, %v2574_v9  ;;  %v1995_v8 = vadd.f32 %v1927_v32, %v1720_v17  ;;  %v2201_v22 = vpop.f32.mrf.mxu3  ;;  %v1655_v4 = vpop.f32.mrf.mxu1 }
 0x24a   : > { %v1721_v26 = vadd.f32 %v1655_v4, %v4422_v3 }
 0x24b   : > { %v2269_v1 = vadd.f32 %v2201_v22, %v1995_v8 }
 0x24c   : > { %v2478_v15 = vpop.f32.mrf.mxu0  ;;  %3338 = vmatmul.msk.f32.gmra.mxu1 %vm222_vm0, %v3496_v58 }
 0x24d   : > { %v2543_v14 = vadd.f32 %v2475_v41, %v2269_v1  ;;  %3402 = vmatmul.msk.f32.gmra.mxu2 %vm222_vm0, %v3370_v63 }
 0x24e   : > { %3466 = vmatmul.msk.f32.gmra.mxu3 %vm222_vm0, %v3434_v27 }
 0x24f   : > { %3530 = vmatmul.msk.f32.gmra.mxu0 %vm222_vm0, %v3498_v38  ;;  %v2575_v61 = vmax.f32 %v2543_v14, 0.0 }
 0x250   : > { %v1930_v6 = vpop.f32.mrf.mxu2 }
 0x251   : > { %v2606_v31 = vadd.f32 %v2605_v21, %v2575_v61  ;;  %v1996_v33 = vadd.f32 %v1930_v6, %v1721_v26  ;;  %v2204_v43 = vpop.f32.mrf.mxu3  ;;  %v1658_v45 = vpop.f32.mrf.mxu1 }
 0x252   : > { %v1722_v3 = vadd.f32 %v1658_v45, %v4433_v10 }
 0x253   : > { %v2270_v47 = vadd.f32 %v2204_v43, %v1996_v33 }
 0x254   : > { %v2481_v29 = vpop.f32.mrf.mxu0 }
 0x255   : > { %v2544_v35 = vadd.f32 %v2478_v15, %v2270_v47 }
 0x257   : > { %v2576_v19 = vmax.f32 %v2544_v35, 0.0 }
 0x258   : > { %v1933_v12 = vpop.f32.mrf.mxu2 }
 0x259   : > { %v2607_v60 = vadd.f32 %v2606_v31, %v2576_v19  ;;  %v1997_v7 = vadd.f32 %v1933_v12, %v1722_v3  ;;  %v2207_v25 = vpop.f32.mrf.mxu3  ;;  %v1661_v16 = vpop.f32.mrf.mxu1 }
 0x25a   : > { %v1723_v44 = vadd.f32 %v1661_v16, %v4444_v42 }
 0x25b   : > { %v2271_v18 = vadd.f32 %v2207_v25, %v1997_v7 }
 0x25c   : > { %v2484_v62 = vpop.f32.mrf.mxu0 }
 0x25d   : > { %v2545_v13 = vadd.f32 %v2481_v29, %v2271_v18 }
 0x25f   : > { %v2577_v58 = vmax.f32 %v2545_v13, 0.0 }
 0x260   : > { %v1936_v0 = vpop.f32.mrf.mxu2 }
 0x261   : > { %v2608_v28 = vadd.f32 %v2607_v60, %v2577_v58  ;;  %v1998_v23 = vadd.f32 %v1936_v0, %v1723_v44  ;;  %v2210_v2 = vpop.f32.mrf.mxu3  ;;  %v1664_v10 = vpop.f32.mrf.mxu1 }
 0x262   : > { %v1724_v34 = vadd.f32 %v1664_v10, %v4455_v46 }
 0x263   : > { %v2272_v59 = vadd.f32 %v2210_v2, %v1998_v23 }
 0x264   : > { %v2487_v52 = vpop.f32.mrf.mxu0 }
 0x265   : > { %v2546_v11 = vadd.f32 %v2484_v62, %v2272_v59 }
 0x267   : > { %v2578_v17 = vmax.f32 %v2546_v11, 0.0 }
 0x268   : > { %v1939_v39 = vpop.f32.mrf.mxu2 }
 0x269   : > { %v2609_v37 = vadd.f32 %v2608_v28, %v2578_v17  ;;  %v1999_v41 = vadd.f32 %v1939_v39, %v1724_v34  ;;  %v2213_v30 = vpop.f32.mrf.mxu3  ;;  %v1667_v42 = vpop.f32.mrf.mxu1 }
 0x26a   : > { %v1725_v56 = vadd.f32 %v1667_v42, %v4467_v53 }
 0x26b   : > { %v2273_v9 = vadd.f32 %v2213_v30, %v1999_v41 }
 0x26c   : > { %v2490_v32 = vpop.f32.mrf.mxu0 }
 0x26d   : > { %v2547_v21 = vadd.f32 %v2487_v52, %v2273_v9 }
 0x26f   : > { %v2579_v8 = vmax.f32 %v2547_v21, 0.0 }
 0x270   : > { %v1942_v22 = vpop.f32.mrf.mxu2 }
 0x271   : > { %v2610_v4 = vadd.f32 %v2609_v37, %v2579_v8  ;;  %v2000_v63 = vadd.f32 %v1942_v22, %v1725_v56  ;;  %v2216_v26 = vpop.f32.mrf.mxu3  ;;  %v1670_v46 = vpop.f32.mrf.mxu1 }
 0x272   : > { %v1726_v1 = vadd.f32 %v1670_v46, %v4478_v50 }
 0x273   : > { %v2274_v27 = vadd.f32 %v2216_v26, %v2000_v63 }
 0x274   : > { %v2493_v15 = vpop.f32.mrf.mxu0 }
 0x275   : > { %v2548_v38 = vadd.f32 %v2490_v32, %v2274_v27 }
 0x277   : > { %v2580_v14 = vmax.f32 %v2548_v38, 0.0 }
 0x278   : > { %v1945_v61 = vpop.f32.mrf.mxu2 }
 0x279   : > { %v2611_v6 = vadd.f32 %v2610_v4, %v2580_v14  ;;  %v2001_v31 = vadd.f32 %v1945_v61, %v1726_v1  ;;  %v2219_v33 = vpop.f32.mrf.mxu3  ;;  %v1673_v53 = vpop.f32.mrf.mxu1 }
 0x27a   : > { %v1727_v47 = vadd.f32 %v1673_v53, %v4489_v24 }
 0x27b   : > { %v2275_v43 = vadd.f32 %v2219_v33, %v2001_v31 }
 0x27c   : > { %v2496_v45 = vpop.f32.mrf.mxu0 }
 0x27d   : > { %v2549_v3 = vadd.f32 %v2493_v15, %v2275_v43 }
 0x27f   : > { %v2581_v29 = vmax.f32 %v2549_v3, 0.0 }
 0x280   : > { %v1948_v35 = vpop.f32.mrf.mxu2 }
 0x281   : > { %v2612_v19 = vadd.f32 %v2611_v6, %v2581_v29  ;;  %v2002_v12 = vadd.f32 %v1948_v35, %v1727_v47  ;;  %v2222_v60 = vpop.f32.mrf.mxu3  ;;  %v1676_v50 = vpop.f32.mrf.mxu1 }
 0x282   : > { %v1728_v44 = vadd.f32 %v1676_v50, %v4500_v49 }
 0x283   : > { %v2276_v7 = vadd.f32 %v2222_v60, %v2002_v12 }
 0x284   : > { %v2499_v25 = vpop.f32.mrf.mxu0 }
 0x285   : > { %v2550_v16 = vadd.f32 %v2496_v45, %v2276_v7 }
 0x287   : > { %v2582_v18 = vmax.f32 %v2550_v16, 0.0 }
 0x288   : > { %v1951_v62 = vpop.f32.mrf.mxu2 }
 0x289   : > { %v2613_v13 = vadd.f32 %v2612_v19, %v2582_v18  ;;  %v2003_v58 = vadd.f32 %v1951_v62, %v1728_v44  ;;  %v2225_v0 = vpop.f32.mrf.mxu3  ;;  %v1679_v28 = vpop.f32.mrf.mxu1 }
 0x28a   : > { %v1729_v10 = vadd.f32 %v1679_v28, %v4511_v57 }
 0x28b   : > { %v2277_v23 = vadd.f32 %v2225_v0, %v2003_v58 }
 0x28c   : > { %v2502_v2 = vpop.f32.mrf.mxu0 }
 0x28d   : > { %v2551_v24 = vadd.f32 %v2499_v25, %v2277_v23 }
 0x28f   : > { %v2583_v34 = vmax.f32 %v2551_v24, 0.0 }
 0x290   : > { %v1954_v59 = vpop.f32.mrf.mxu2 }
 0x291   : > { %v2614_v52 = vadd.f32 %v2613_v13, %v2583_v34  ;;  %v2004_v11 = vadd.f32 %v1954_v59, %v1729_v10  ;;  %v2228_v17 = vpop.f32.mrf.mxu3  ;;  %v1682_v39 = vpop.f32.mrf.mxu1 }
 0x292   : > { %v1730_v30 = vadd.f32 %v1682_v39, %v4522_v5 }
 0x293   : > { %v2278_v37 = vadd.f32 %v2228_v17, %v2004_v11 }
 0x294   : > { %v2505_v41 = vpop.f32.mrf.mxu0 }
 0x295   : > { %v2552_v49 = vadd.f32 %v2502_v2, %v2278_v37 }
 0x297   : > { %v2584_v42 = vmax.f32 %v2552_v49, 0.0 }
 0x298   : > { %v1957_v56 = vpop.f32.mrf.mxu2 }
 0x299   : > { %v2615_v9 = vadd.f32 %v2614_v52, %v2584_v42  ;;  %v2005_v32 = vadd.f32 %v1957_v56, %v1730_v30  ;;  %v2231_v21 = vpop.f32.mrf.mxu3  ;;  %v1685_v8 = vpop.f32.mrf.mxu1 }
 0x29a   : > { %v1731_v63 = vadd.f32 %v1685_v8, %v4533_v54 }
 0x29b   : > { %v2279_v22 = vadd.f32 %v2231_v21, %v2005_v32 }
 0x29c   : > { %v2508_v4 = vpop.f32.mrf.mxu0 }
 0x29d   : > { %v2553_v57 = vadd.f32 %v2505_v41, %v2279_v22 }
 0x29f   : > { %v2585_v26 = vmax.f32 %v2553_v57, 0.0 }
 0x2a0   : > { %v1960_v46 = vpop.f32.mrf.mxu2 }
 0x2a1   : > { %v2616_v1 = vadd.f32 %v2615_v9, %v2585_v26  ;;  %v2006_v27 = vadd.f32 %v1960_v46, %v1731_v63  ;;  %v2234_v15 = vpop.f32.mrf.mxu3  ;;  %v1688_v38 = vpop.f32.mrf.mxu1 }
 0x2a2   : > { %v1732_v6 = vadd.f32 %v1688_v38, %v4544_v36 }
 0x2a3   : > { %v2280_v14 = vadd.f32 %v2234_v15, %v2006_v27 }
 0x2a4   : > { %v2511_v61 = vpop.f32.mrf.mxu0 }
 0x2a5   : > { %v2554_v5 = vadd.f32 %v2508_v4, %v2280_v14 }
 0x2a7   : > { %v2586_v31 = vmax.f32 %v2554_v5, 0.0 }
 0x2a8   : > { %v1963_v33 = vpop.f32.mrf.mxu2 }
 0x2a9   : > { %v2617_v53 = vadd.f32 %v2616_v1, %v2586_v31  ;;  %v2007_v43 = vadd.f32 %v1963_v33, %v1732_v6  ;;  %v2237_v45 = vpop.f32.mrf.mxu3  ;;  %v1691_v3 = vpop.f32.mrf.mxu1 }
 0x2aa   : > { %v1733_v35 = vadd.f32 %v1691_v3, %v4555_v20 }
 0x2ab   : > { %v2281_v47 = vadd.f32 %v2237_v45, %v2007_v43 }
 0x2ac   : > { %v2514_v29 = vpop.f32.mrf.mxu0 }
 0x2ad   : > { %v2555_v54 = vadd.f32 %v2511_v61, %v2281_v47 }
 0x2af   : > { %v2587_v19 = vmax.f32 %v2555_v54, 0.0 }
 0x2b0   : > { %v1966_v12 = vpop.f32.mrf.mxu2 }
 0x2b1   : > { %v2618_v60 = vadd.f32 %v2617_v53, %v2587_v19  ;;  %v2008_v50 = vadd.f32 %v1966_v12, %v1733_v35  ;;  %v2240_v7 = vpop.f32.mrf.mxu3  ;;  %v1694_v25 = vpop.f32.mrf.mxu1 }
 0x2b2   : > { %v1734_v18 = vadd.f32 %v1694_v25, %v4566_v55 }
 0x2b3   : > { %v2282_v16 = vadd.f32 %v2240_v7, %v2008_v50 }
 0x2b4   : > { %v2517_v44 = vpop.f32.mrf.mxu0 }
 0x2b5   : > { %v2556_v36 = vadd.f32 %v2514_v29, %v2282_v16 }
 0x2b7   : > { %v2588_v62 = vmax.f32 %v2556_v36, 0.0 }
 0x2b8   : > { %v1969_v13 = vpop.f32.mrf.mxu2 }
 0x2b9   : > { %v2619_v58 = vadd.f32 %v2618_v60, %v2588_v62  ;;  %v2009_v0 = vadd.f32 %v1969_v13, %v1734_v18  ;;  %v2243_v28 = vpop.f32.mrf.mxu3  ;;  %v1697_v23 = vpop.f32.mrf.mxu1 }
 0x2ba   : > { %v1735_v10 = vadd.f32 %v1697_v23, %v4577_v48 }
 0x2bb   : > { %v2283_v2 = vadd.f32 %v2243_v28, %v2009_v0 }
 0x2bc   : > { %v2520_v20 = vpop.f32.mrf.mxu0 }
 0x2bd   : > { %v2557_v24 = vadd.f32 %v2517_v44, %v2283_v2 }
 0x2bf   : > { %v2589_v34 = vmax.f32 %v2557_v24, 0.0 }
 0x2c0   : > { %v1972_v59 = vpop.f32.mrf.mxu2 }
 0x2c1   : > { %v2620_v52 = vadd.f32 %v2619_v58, %v2589_v34  ;;  %v2010_v11 = vadd.f32 %v1972_v59, %v1735_v10  ;;  %v2246_v17 = vpop.f32.mrf.mxu3  ;;  %v1700_v39 = vpop.f32.mrf.mxu1 }
 0x2c2   : > { %v1736_v55 = vadd.f32 %v1700_v39, %v4588_v40 }
 0x2c3   : > { %v2284_v37 = vadd.f32 %v2246_v17, %v2010_v11 }
 0x2c4   : > { %v2523_v42 = vpop.f32.mrf.mxu0 }
 0x2c5   : > { %v2558_v41 = vadd.f32 %v2520_v20, %v2284_v37 }
 0x2c7   : > { %v2590_v49 = vmax.f32 %v2558_v41, 0.0 }
 0x2c8   : > { %v1975_v30 = vpop.f32.mrf.mxu2 }
 0x2c9   : > { %v2621_v56 = vadd.f32 %v2620_v52, %v2590_v49  ;;  %v2011_v9 = vadd.f32 %v1975_v30, %v1736_v55  ;;  %v2249_v32 = vpop.f32.mrf.mxu3  ;;  %v1703_v8 = vpop.f32.mrf.mxu1 }
 0x2ca   : > { %v1737_v48 = vadd.f32 %v1703_v8, %v4599_v51 }
 0x2cb   : > { %v2285_v21 = vadd.f32 %v2249_v32, %v2011_v9 }
 0x2cc   : > { %v2526_v1 = vpop.f32.mrf.mxu0 }
 0x2cd   : > { %v2559_v22 = vadd.f32 %v2523_v42, %v2285_v21 }
 0x2cf   : > { %v2591_v4 = vmax.f32 %v2559_v22, 0.0 }
 0x2d0   : > { %v1978_v57 = vpop.f32.mrf.mxu2 }
 0x2d1   : > { %v2622_v63 = vadd.f32 %v2621_v56, %v2591_v4  ;;  %v2012_v26 = vadd.f32 %v1978_v57, %v1737_v48  ;;  %v2252_v46 = vpop.f32.mrf.mxu3 }
 0x2d3   : > { %v2286_v27 = vadd.f32 %v2252_v46, %v2012_v26 }
 0x2d5   : > { %v2560_v40 = vadd.f32 %v2526_v1, %v2286_v27 }
 0x2d7   : > { %v2592_v15 = vmax.f32 %v2560_v40, 0.0 }
 0x2d9   : > { %v2623_v38 = vadd.f32 %v2622_v63, %v2592_v15 }
 0x2db   : > { %v2624_v14 = vrot.slane %v2623_v38, 4 }
 0x2dd   : > { %v2625_v61 = vadd.f32 %v2624_v14, %v2623_v38 }
 0x2df   : > { %v2626_v5 = vrot.slane %v2625_v61, 2 }
 0x2e1   : > { %v2627_v6 = vadd.f32 %v2626_v5, %v2625_v61 }
 0x2e3   : > { %v2628_v31 = vrot.slane %v2627_v6, 1 }
 0x2e5   : > { %v2629_v33 = vadd.f32 %v2628_v31, %v2627_v6  ;;  %2636 = sbr.rel (%p3532_p4) target bundleno = 1667 (0x683), region = 32 }
 0x2e7   : > { %v2630_v53 = vmul.f32 0.00390625, %v2629_v33 }
 0x2e9   : > { %3541 = vst [vmem:[%s3539_s10 - $0x1] sm:$0x1] %v2630_v53 }
 0x2ea   : > { %v2661_v51 = vld [vmem:[%s5065_s1 + $0xc0] sm:$0xff]  ;;  %v2660_v43 = vld [vmem:[%s5065_s1 + $0xb8] sm:$0xff]  ;;  %v2659_v45 = vld [vmem:[%s5065_s1 + $0xb0] sm:$0xff]  ;;  %v3659_v18 = vmov 2.0   ;;  %vm2682_vm1 = vcmask 1041408  }
 0x2eb   : > { %2662 = vmatpush.msra.mxu0 %v2661_v51  ;;  %v2658_v3 = vld [vmem:[%s5065_s1 + $0xa8] sm:$0xff]  ;;  %v2657_v47 = vld [vmem:[%s5065_s1 + $0xa0] sm:$0xff]  ;;  %v2656_v29 = vld [vmem:[%s5065_s1 + $0x98] sm:$0xff]  ;;  %3577 = vrcp.f32 %v3659_v18 }
 0x2ec   : > { %v2655_v54 = vld [vmem:[%s5065_s1 + $0x90] sm:$0xff]  ;;  %v2654_v35 = vld [vmem:[%s5065_s1 + $0x88] sm:$0xff]  ;;  %v2653_v19 = vld [vmem:[%s5065_s1 + $0x80] sm:$0xff] }
 0x2ed   : > { %2663 = vmatpush.msra.mxu0 %v2660_v43  ;;  %v2652_v12 = vld [vmem:[%s5065_s1 + $0x78] sm:$0xff]  ;;  %v2651_v60 = vld [vmem:[%s5065_s1 + $0x70] sm:$0xff]  ;;  %v2650_v50 = vld [vmem:[%s5065_s1 + $0x68] sm:$0xff] }
 0x2ee   : > { %v2649_v7 = vld [vmem:[%s5065_s1 + $0x60] sm:$0xff]  ;;  %v2648_v25 = vld [vmem:[%s5065_s1 + $0x58] sm:$0xff]  ;;  %v2647_v16 = vld [vmem:[%s5065_s1 + $0x50] sm:$0xff] }
 0x2ef   : > { %2664 = vmatpush.msra.mxu0 %v2659_v45  ;;  %v2646_v44 = vld [vmem:[%s5065_s1 + $0x48] sm:$0xff]  ;;  %v2740_v0 = vld [vmem:[%s5065_s1 + $0x140] sm:$0xff]  ;;  %v2739_v2 = vld [vmem:[%s5065_s1 + $0x138] sm:$0xff] }
 0x2f0   : > { %v2645_v36 = vld [vmem:[#allocation2] sm:$0x3]  ;;  %2741 = vmatpush.msra.mxu1 %v2740_v0  ;;  %v2738_v10 = vld [vmem:[%s5065_s1 + $0x130] sm:$0xff]  ;;  %v2737_v59 = vld [vmem:[%s5065_s1 + $0x128] sm:$0xff] }
 0x2f1   : > { %2665 = vmatpush.msra.mxu0 %v2658_v3  ;;  %v3578_v62 = vpop.eup %3577  ;;  %v2736_v17 = vld [vmem:[%s5065_s1 + $0x120] sm:$0xff]  ;;  %v2735_v37 = vld [vmem:[%s5065_s1 + $0x118] sm:$0xff]  ;;  %v2734_v49 = vld [vmem:[%s5065_s1 + $0x110] sm:$0xff] }
 0x2f2   : > { %v2691_v13 = vmul.f32 2.0, %v3578_v62  ;;  %2742 = vmatpush.msra.mxu1 %v2739_v2  ;;  %vm2695_vm2 = vweird.f32 %v3578_v62  ;;  %v2733_v42 = vld [vmem:[%s5065_s1 + $0x108] sm:$0xff]  ;;  %v2732_v9 = vld [vmem:[%s5065_s1 + $0x100] sm:$0xff]  ;;  %v2731_v21 = vld [vmem:[%s5065_s1 + $0xf8] sm:$0xff] }
 0x2f3   : > { %2666 = vmatpush.msra.mxu0 %v2657_v47  ;;  %v2730_v22 = vld [vmem:[%s5065_s1 + $0xf0] sm:$0xff]  ;;  %v2729_v57 = vld [vmem:[%s5065_s1 + $0xe8] sm:$0xff]  ;;  %v2728_v26 = vld [vmem:[%s5065_s1 + $0xe0] sm:$0xff] }
 0x2f4   : > { %v2692_v58 = vsub.f32 1.0, %v2691_v13  ;;  %2743 = vmatpush.msra.mxu1 %v2738_v10  ;;  %v2727_v46 = vld [vmem:[%s5065_s1 + $0xd8] sm:$0xff]  ;;  %v2726_v27 = vld [vmem:[%s5065_s1 + $0xd0] sm:$0xff]  ;;  %v2725_v15 = vld [vmem:[%s5065_s1 + $0xc8] sm:$0xff] }
 0x2f5   : > { %2667 = vmatpush.msra.mxu0 %v2656_v29  ;;  %v3569_v45 = vld [vmem:[%s5065_s1 + $0x2c8] ss:$0 sm:$0xff]  ;;  %v3570_v29 = vld [vmem:[%s5065_s1 + $0x2c9] ss:$0 sm:$0xff] }
 0x2f6   : > { %v2693_v20 = vmul.f32 %v3578_v62, %v2692_v58  ;;  %2744 = vmatpush.msra.mxu1 %v2737_v59  ;;  %v2806_v58 = vld [vmem:[%s5065_s1 + $0x198] sm:$0xff]  ;;  %v2804_v2 = vld [vmem:[%s5065_s1 + $0x188] sm:$0xff] }
 0x2f7   : > { %2668 = vmatpush.msra.mxu0 %v2655_v54 }
 0x2f8   : > { %v2694_v11 = vadd.f32 %v3578_v62, %v2693_v20  ;;  %2745 = vmatpush.msra.mxu1 %v2736_v17  ;;  %v2803_v20 = vld [vmem:[%s5065_s1 + $0x180] sm:$0xff] }
 0x2f9   : > { %2669 = vmatpush.msra.mxu0 %v2654_v35 }
 0x2fa   : > { %2746 = vmatpush.msra.mxu1 %v2735_v37  ;;  %v4827_v55 = vsel %vm2695_vm2, %v3578_v62, %v2694_v11  ;;  %v2807_v62 = vld [vmem:[%s5065_s1 + $0x1a0] sm:$0xff] }
 0x2fb   : > { %2670 = vmatpush.msra.mxu0 %v2653_v19 }
 0x2fc   : > { %2747 = vmatpush.msra.mxu1 %v2734_v49  ;;  %v2798_v49 = vld [vmem:[%s5065_s1 + $0x158] sm:$0xff] }
 0x2fd   : > { %2671 = vmatpush.msra.mxu0 %v2652_v12  ;;  %v2811_v12 = vld [vmem:[%s5065_s1 + $0x1c0] sm:$0xff] }
 0x2fe   : > { %2748 = vmatpush.msra.mxu1 %v2733_v42  ;;  %2813 = vmatpush.msra.mxu2 %v2811_v12  ;;  %v2797_v42 = vld [vmem:[%s5065_s1 + $0x150] sm:$0xff] }
 0x2ff   : > { %2672 = vmatpush.msra.mxu0 %v2651_v60 }
 0x300   : > { %2749 = vmatpush.msra.mxu1 %v2732_v9  ;;  %v2796_v9 = vld [vmem:[%s5065_s1 + $0x148] sm:$0xff] }
 0x301   : > { %2673 = vmatpush.msra.mxu0 %v2650_v50 }
 0x302   : > { %2750 = vmatpush.msra.mxu1 %v2731_v21 }
 0x303   : > { %2674 = vmatpush.msra.mxu0 %v2649_v7  ;;  %v2810_v7 = vld [vmem:[%s5065_s1 + $0x1b8] sm:$0xff] }
 0x304   : > { %2751 = vmatpush.msra.mxu1 %v2730_v22  ;;  %2814 = vmatpush.msra.mxu2 %v2810_v7  ;;  %v2870_v7 = vld [vmem:[%s5065_s1 + $0x1f8] sm:$0xff] }
 0x305   : > { %2675 = vmatpush.msra.mxu0 %v2648_v25 }
 0x306   : > { %2752 = vmatpush.msra.mxu1 %v2729_v57 }
 0x307   : > { %2676 = vmatpush.msra.mxu0 %v2647_v16  ;;  %v2809_v16 = vld [vmem:[%s5065_s1 + $0x1b0] sm:$0xff] }
 0x308   : > { %2753 = vmatpush.msra.mxu1 %v2728_v26  ;;  %2815 = vmatpush.msra.mxu2 %v2809_v16  ;;  %v2869_v16 = vld [vmem:[%s5065_s1 + $0x1f0] sm:$0xff] }
 0x309   : > { %2677 = vmatpush.msra.mxu0 %v2646_v44 }
 0x30a   : > { %2678 = vmatmul.f32.vlgmr.msra.gmra.mxu0 %v2645_v36  ;;  %2754 = vmatpush.msra.mxu1 %v2727_v46  ;;  %v2808_v36 = vld [vmem:[%s5065_s1 + $0x1a8] sm:$0xff] }
 0x30b   : > { %2816 = vmatpush.msra.mxu2 %v2808_v36  ;;  %v2868_v36 = vld [vmem:[%s5065_s1 + $0x1e8] sm:$0xff] }
 0x30c   : > { %2755 = vmatpush.msra.mxu1 %v2726_v27 }
 0x30d   : > { %2817 = vmatpush.msra.mxu2 %v2807_v62  ;;  %v2867_v62 = vld [vmem:[%s5065_s1 + $0x1e0] sm:$0xff] }
 0x30e   : > { %2756 = vmatpush.msra.mxu1 %v2725_v15  ;;  %v3572_v15 = vld [vmem:[%s5065_s1 + $0x2cb] ss:$0 sm:$0xff] }
 0x30f   : > { %2818 = vmatpush.msra.mxu2 %v2806_v58  ;;  %v2866_v58 = vld [vmem:[%s5065_s1 + $0x1d8] sm:$0xff] }
 0x387   : > { %v2679_v28 = vpop.f32.mrf.mxu0 }
 0x388   : > { %v2683_v23 = vsel %vm2682_vm1, %v2679_v28, 0.0 }
 0x389   : > { %v2684_v24 = vrot.slane %v2683_v23, 4 }
 0x38b   : > { %v2685_v34 = vadd.f32 %v2684_v24, %v2683_v23 }
 0x38d   : > { %v2686_v52 = vrot.slane %v2685_v34, 2 }
 0x38f   : > { %v2687_v39 = vadd.f32 %v2686_v52, %v2685_v34  ;;  %v2802_v34 = vld [vmem:[%s5065_s1 + $0x178] sm:$0xff]  ;;  %v2801_v52 = vld [vmem:[%s5065_s1 + $0x170] sm:$0xff] }
 0x391   : > { %v2688_v41 = vrot.slane %v2687_v39, 1 }
 0x393   : > { %v2689_v30 = vadd.f32 %v2688_v41, %v2687_v39  ;;  %v2800_v39 = vld [vmem:[%s5065_s1 + $0x168] sm:$0xff]  ;;  %v2799_v41 = vld [vmem:[%s5065_s1 + $0x160] sm:$0xff] }
 0x395   : > { %v2697_v56 = vmul.f32 %v4827_v55, %v2689_v30 }
 0x397   : > { %v2698_v32 = vsub.f32 %v2679_v28, %v2697_v56  ;;  %v2805_v28 = vld [vmem:[%s5065_s1 + $0x190] sm:$0xff] }
 0x398   : > { %2819 = vmatpush.msra.mxu2 %v2805_v28  ;;  %v2865_v28 = vld [vmem:[%s5065_s1 + $0x1d0] sm:$0xff] }
 0x399   : > { %v2699_v8 = vmul.f32 %v2698_v32, %v2698_v32 }
 0x39a   : > { %2820 = vmatpush.msra.mxu2 %v2804_v2 }
 0x39b   : > { %v2700_v48 = vsel %vm2682_vm1, %v2699_v8, 0.0 }
 0x39c   : > { %v2701_v4 = vrot.slane %v2700_v48, 4  ;;  %2821 = vmatpush.msra.mxu2 %v2803_v20 }
 0x39e   : > { %v2702_v63 = vadd.f32 %v2701_v4, %v2700_v48  ;;  %2822 = vmatpush.msra.mxu2 %v2802_v34 }
 0x3a0   : > { %v2703_v1 = vrot.slane %v2702_v63, 2  ;;  %2823 = vmatpush.msra.mxu2 %v2801_v52 }
 0x3a2   : > { %v2704_v40 = vadd.f32 %v2703_v1, %v2702_v63  ;;  %2824 = vmatpush.msra.mxu2 %v2800_v39  ;;  %v3571_v1 = vld [vmem:[%s5065_s1 + $0x2ca] ss:$0 sm:$0xff] }
 0x3a4   : > { %v2705_v38 = vrot.slane %v2704_v40, 1  ;;  %2825 = vmatpush.msra.mxu2 %v2799_v41 }
 0x3a6   : > { %v2706_v14 = vadd.f32 %v2705_v38, %v2704_v40  ;;  %2826 = vmatpush.msra.mxu2 %v2798_v49 }
 0x3a8   : > { %v2707_v61 = vmul.f32 %v2706_v14, %v4827_v55  ;;  %2827 = vmatpush.msra.mxu2 %v2797_v42 }
 0x3aa   : > { %v2708_v5 = vadd.f32 1e-05, %v2707_v61  ;;  %2828 = vmatpush.msra.mxu2 %v2796_v9 }
 0x3ac   : > { %3579 = vrsqrt.f32 %v2708_v5  ;;  %vm2715_vm4 = vweird.f32 %v2708_v5 }
 0x3b2   : > { %v3580_v6 = vpop.eup %3579 }
 0x3b3   : > { %v2710_v31 = vmul.f32 %v3580_v6, %v2708_v5  ;;  %vm2716_vm3 = vweird.f32 %v3580_v6  ;;  %v2879_v5 = vld [vmem:[%s5065_s1 + $0x240] sm:$0xff] }
 0x3b4   : > { %vm2717_vm5 = vmor %vm2715_vm4, %vm2716_vm3  ;;  %2880 = vmatpush.msra.mxu3 %v2879_v5  ;;  %v2942_v5 = vld [vmem:[%s5065_s1 + $0x280] sm:$0xff] }
 0x3b5   : > { %v2711_v33 = vmul.f32 %v3580_v6, %v2710_v31  ;;  %v2878_v31 = vld [vmem:[%s5065_s1 + $0x238] sm:$0xff] }
 0x3b6   : > { %2881 = vmatpush.msra.mxu3 %v2878_v31  ;;  %v2941_v31 = vld [vmem:[%s5065_s1 + $0x278] sm:$0xff] }
 0x3b7   : > { %v2712_v53 = vmul.f32 0.5, %v2711_v33  ;;  %v2877_v33 = vld [vmem:[%s5065_s1 + $0x230] sm:$0xff] }
 0x3b8   : > { %2882 = vmatpush.msra.mxu3 %v2877_v33 }
 0x3b9   : > { %v2713_v51 = vsub.f32 1.5, %v2712_v53 }
 0x3bb   : > { %v2714_v43 = vmul.f32 %v3580_v6, %v2713_v51 }
 0x3bd   : > { %v2718_v3 = vsel %vm2717_vm5, %v3580_v6, %v2714_v43  ;;  %v3573_v6 = vld [vmem:[%s5065_s1 + $0x2cc] ss:$0 sm:$0xff] }
 0x3be   : > { %v2719_v47 = vmul.f32 %v2718_v3, %v2698_v32  ;;  %v2876_v43 = vld [vmem:[%s5065_s1 + $0x228] sm:$0xff] }
 0x3bf   : > { %2883 = vmatpush.msra.mxu3 %v2876_v43 }
 0x3c0   : > { %v2721_v54 = vmul.f32 %v3569_v45, %v2719_v47  ;;  %v2875_v45 = vld [vmem:[%s5065_s1 + $0x220] sm:$0xff]  ;;  %v2874_v47 = vld [vmem:[%s5065_s1 + $0x218] sm:$0xff] }
 0x3c1   : > { %2884 = vmatpush.msra.mxu3 %v2875_v45  ;;  %v2939_v45 = vld [vmem:[%s5065_s1 + $0x268] sm:$0xff] }
 0x3c2   : > { %v2723_v35 = vadd.f32 %v3570_v29, %v2721_v54  ;;  %v2873_v54 = vld [vmem:[%s5065_s1 + $0x210] sm:$0xff] }
 0x3c3   : > { %2885 = vmatpush.msra.mxu3 %v2874_v47  ;;  %v2938_v47 = vld [vmem:[%s5065_s1 + $0x260] sm:$0xff] }
 0x3c4   : > { %v2724_v19 = vmax.f32 %v2723_v35, 0.0 }
 0x3c5   : > { %2886 = vmatpush.msra.mxu3 %v2873_v54  ;;  %v2937_v54 = vld [vmem:[%s5065_s1 + $0x258] sm:$0xff] }
 0x3c6   : > { %2757 = vmatmul.f32.vlgmr.msra.gmra.mxu1 %v2724_v19  ;;  %v2872_v19 = vld [vmem:[%s5065_s1 + $0x208] sm:$0xff] }
 0x3c7   : > { %2887 = vmatpush.msra.mxu3 %v2872_v19 }
 0x443   : > { %v2758_v60 = vpop.f32.mrf.mxu1 }
 0x444   : > { %v2761_v50 = vsel %vm2682_vm1, %v2758_v60, 0.0 }
 0x445   : > { %v2762_v25 = vrot.slane %v2761_v50, 4 }
 0x447   : > { %v2763_v44 = vadd.f32 %v2762_v25, %v2761_v50 }
 0x449   : > { %v2764_v18 = vrot.slane %v2763_v44, 2 }
 0x44b   : > { %v2765_v13 = vadd.f32 %v2764_v18, %v2763_v44 }
 0x44d   : > { %v2766_v0 = vrot.slane %v2765_v13, 1 }
 0x44f   : > { %v2767_v23 = vadd.f32 %v2766_v0, %v2765_v13 }
 0x451   : > { %v2768_v24 = vmul.f32 %v2767_v23, %v4827_v55 }
 0x453   : > { %v2769_v10 = vsub.f32 %v2758_v60, %v2768_v24  ;;  %v2871_v60 = vld [vmem:[%s5065_s1 + $0x200] sm:$0xff]  ;;  %v2864_v24 = vld [vmem:[%s5065_s1 + $0x1c8] sm:$0xff] }
 0x454   : > { %2888 = vmatpush.msra.mxu3 %v2871_v60 }
 0x455   : > { %v2770_v59 = vmul.f32 %v2769_v10, %v2769_v10 }
 0x456   : > { %2889 = vmatpush.msra.mxu3 %v2870_v7 }
 0x457   : > { %v2771_v11 = vsel %vm2682_vm1, %v2770_v59, 0.0 }
 0x458   : > { %v2772_v17 = vrot.slane %v2771_v11, 4  ;;  %2890 = vmatpush.msra.mxu3 %v2869_v16 }
 0x45a   : > { %v2773_v37 = vadd.f32 %v2772_v17, %v2771_v11  ;;  %2891 = vmatpush.msra.mxu3 %v2868_v36 }
 0x45c   : > { %v2774_v30 = vrot.slane %v2773_v37, 2  ;;  %2892 = vmatpush.msra.mxu3 %v2867_v62 }
 0x45e   : > { %v2775_v56 = vadd.f32 %v2774_v30, %v2773_v37  ;;  %2893 = vmatpush.msra.mxu3 %v2866_v58  ;;  %v3574_v58 = vld [vmem:[%s5065_s1 + $0x2cd] ss:$0 sm:$0xff] }
 0x460   : > { %v2776_v32 = vrot.slane %v2775_v56, 1  ;;  %2894 = vmatpush.msra.mxu3 %v2865_v28 }
 0x462   : > { %v2777_v21 = vadd.f32 %v2776_v32, %v2775_v56  ;;  %2895 = vmatpush.msra.mxu3 %v2864_v24  ;;  %v2950_v32 = vld [vmem:[%s5065_s1 + $0x2c0] sm:$0xff] }
 0x463   : > { %2952 = vmatpush.msrb.mxu0 %v2950_v32 }
 0x464   : > { %v2778_v8 = vmul.f32 %v2777_v21, %v4827_v55 }
 0x466   : > { %v2779_v22 = vadd.f32 1e-05, %v2778_v8 }
 0x468   : > { %3581 = vrsqrt.f32 %v2779_v22  ;;  %vm2786_vm7 = vweird.f32 %v2779_v22 }
 0x46e   : > { %v3582_v48 = vpop.eup %3581 }
 0x46f   : > { %v2781_v4 = vmul.f32 %v3582_v48, %v2779_v22  ;;  %vm2787_vm6 = vweird.f32 %v3582_v48  ;;  %v2949_v22 = vld [vmem:[%s5065_s1 + $0x2b8] sm:$0xff] }
 0x470   : > { %vm2788_vm8 = vmor %vm2786_vm7, %vm2787_vm6  ;;  %2953 = vmatpush.msrb.mxu0 %v2949_v22 }
 0x471   : > { %v2782_v57 = vmul.f32 %v3582_v48, %v2781_v4  ;;  %v2948_v4 = vld [vmem:[%s5065_s1 + $0x2b0] sm:$0xff] }
 0x472   : > { %2954 = vmatpush.msrb.mxu0 %v2948_v4 }
 0x473   : > { %v2783_v63 = vmul.f32 0.5, %v2782_v57 }
 0x475   : > { %v2784_v26 = vsub.f32 1.5, %v2783_v63  ;;  %v2947_v63 = vld [vmem:[%s5065_s1 + $0x2a8] sm:$0xff] }
 0x476   : > { %2955 = vmatpush.msrb.mxu0 %v2947_v63 }
 0x477   : > { %v2785_v46 = vmul.f32 %v3582_v48, %v2784_v26 }
 0x479   : > { %v2789_v27 = vsel %vm2788_vm8, %v3582_v48, %v2785_v46  ;;  %v2946_v46 = vld [vmem:[%s5065_s1 + $0x2a0] sm:$0xff] }
 0x47a   : > { %v2790_v40 = vmul.f32 %v2789_v27, %v2769_v10  ;;  %2956 = vmatpush.msrb.mxu0 %v2946_v46  ;;  %v2945_v27 = vld [vmem:[%s5065_s1 + $0x298] sm:$0xff] }
 0x47c   : > { %v2792_v38 = vmul.f32 %v3571_v1, %v2790_v40  ;;  %2957 = vmatpush.msrb.mxu0 %v2945_v27 }
 0x47e   : > { %v2794_v14 = vadd.f32 %v3572_v15, %v2792_v38  ;;  %v2944_v15 = vld [vmem:[%s5065_s1 + $0x290] sm:$0xff] }
 0x47f   : > { %2958 = vmatpush.msrb.mxu0 %v2944_v15 }
 0x480   : > { %v2795_v61 = vmax.f32 %v2794_v14, 0.0  ;;  %v2943_v14 = vld [vmem:[%s5065_s1 + $0x288] sm:$0xff] }
 0x481   : > { %2959 = vmatpush.msrb.mxu0 %v2943_v14 }
 0x482   : > { %2829 = vmatmul.f32.vlgmr.msra.gmra.mxu2 %v2795_v61 }
 0x483   : > { %2960 = vmatpush.msrb.mxu0 %v2942_v5 }
 0x485   : > { %2961 = vmatpush.msrb.mxu0 %v2941_v31 }
 0x505   : > { %v2830_v53 = vpop.f32.mrf.mxu2 }
 0x506   : > { %v2831_v51 = vadd.f32 %v3573_v6, %v2830_v53  ;;  %v2940_v53 = vld [vmem:[%s5065_s1 + $0x270] sm:$0xff] }
 0x507   : > { %2962 = vmatpush.msrb.mxu0 %v2940_v53 }
 0x508   : > { %v2833_v3 = vsel %vm2682_vm1, %v2831_v51, 0.0 }
 0x509   : > { %v2834_v29 = vrot.slane %v2833_v3, 4  ;;  %2963 = vmatpush.msrb.mxu0 %v2939_v45 }
 0x50b   : > { %v2835_v35 = vadd.f32 %v2834_v29, %v2833_v3  ;;  %2964 = vmatpush.msrb.mxu0 %v2938_v47 }
 0x50d   : > { %v2836_v12 = vrot.slane %v2835_v35, 2  ;;  %2965 = vmatpush.msrb.mxu0 %v2937_v54 }
 0x50f   : > { %v2837_v50 = vadd.f32 %v2836_v12, %v2835_v35  ;;  %v2936_v35 = vld [vmem:[%s5065_s1 + $0x250] sm:$0xff]  ;;  %v2935_v12 = vld [vmem:[%s5065_s1 + $0x248] sm:$0xff] }
 0x510   : > { %2966 = vmatpush.msrb.mxu0 %v2936_v35 }
 0x511   : > { %v2838_v25 = vrot.slane %v2837_v50, 1 }
 0x512   : > { %2967 = vmatpush.msrb.mxu0 %v2935_v12 }
 0x513   : > { %v2839_v44 = vadd.f32 %v2838_v25, %v2837_v50 }
 0x515   : > { %v2840_v18 = vmul.f32 %v2839_v44, %v4827_v55 }
 0x517   : > { %v2841_v13 = vsub.f32 %v2831_v51, %v2840_v18 }
 0x519   : > { %v2842_v0 = vmul.f32 %v2841_v13, %v2841_v13 }
 0x51b   : > { %v2843_v23 = vsel %vm2682_vm1, %v2842_v0, 0.0 }
 0x51c   : > { %v2844_v2 = vrot.slane %v2843_v23, 4 }
 0x51e   : > { %v2845_v20 = vadd.f32 %v2844_v2, %v2843_v23 }
 0x520   : > { %v2846_v10 = vrot.slane %v2845_v20, 2 }
 0x522   : > { %v2847_v34 = vadd.f32 %v2846_v10, %v2845_v20  ;;  %v3576_v20 = vld [vmem:[%s5065_s1 + $0x2cf] ss:$0 sm:$0xff] }
 0x524   : > { %v2848_v59 = vrot.slane %v2847_v34, 1 }
 0x526   : > { %v2849_v52 = vadd.f32 %v2848_v59, %v2847_v34 }
 0x528   : > { %v2850_v11 = vmul.f32 %v2849_v52, %v4827_v55 }
 0x52a   : > { %v2851_v17 = vadd.f32 1e-05, %v2850_v11 }
 0x52c   : > { %3583 = vrsqrt.f32 %v2851_v17  ;;  %vm2858_vm10 = vweird.f32 %v2851_v17 }
 0x532   : > { %v3584_v39 = vpop.eup %3583 }
 0x533   : > { %v2853_v37 = vmul.f32 %v3584_v39, %v2851_v17  ;;  %vm2859_vm9 = vweird.f32 %v3584_v39 }
 0x534   : > { %vm2860_vm11 = vmor %vm2858_vm10, %vm2859_vm9 }
 0x535   : > { %v2854_v41 = vmul.f32 %v3584_v39, %v2853_v37 }
 0x537   : > { %v2855_v49 = vmul.f32 0.5, %v2854_v41 }
 0x539   : > { %v2856_v30 = vsub.f32 1.5, %v2855_v49 }
 0x53b   : > { %v2857_v42 = vmul.f32 %v3584_v39, %v2856_v30 }
 0x53d   : > { %v2861_v56 = vsel %vm2860_vm11, %v3584_v39, %v2857_v42 }
 0x53e   : > { %v2862_v9 = vmul.f32 %v2861_v56, %v2841_v13 }
 0x540   : > { %2863 = vst [vmem:[#allocation5] sm:$0x3] %v2862_v9  ;;  %2896 = vmatmul.f32.vlgmr.msra.gmra.mxu3 %v2862_v9 }
 0x5c3   : > { %v2897_v21 = vpop.f32.mrf.mxu3 }
 0x5c4   : > { %v2900_v8 = vsel %vm2682_vm1, %v2897_v21, 0.0 }
 0x5c5   : > { %v2901_v48 = vrot.slane %v2900_v8, 4 }
 0x5c7   : > { %v2902_v57 = vadd.f32 %v2901_v48, %v2900_v8 }
 0x5c9   : > { %v2903_v26 = vrot.slane %v2902_v57, 2 }
 0x5cb   : > { %v2904_v1 = vadd.f32 %v2903_v26, %v2902_v57 }
 0x5cd   : > { %v2905_v40 = vrot.slane %v2904_v1, 1 }
 0x5cf   : > { %v2906_v38 = vadd.f32 %v2905_v40, %v2904_v1 }
 0x5d1   : > { %v2907_v61 = vmul.f32 %v2906_v38, %v4827_v55 }
 0x5d3   : > { %v2908_v6 = vsub.f32 %v2897_v21, %v2907_v61 }
 0x5d5   : > { %v2909_v33 = vmul.f32 %v2908_v6, %v2908_v6 }
 0x5d7   : > { %v2910_v51 = vsel %vm2682_vm1, %v2909_v33, 0.0 }
 0x5d8   : > { %v2911_v43 = vrot.slane %v2910_v51, 4 }
 0x5da   : > { %v2912_v3 = vadd.f32 %v2911_v43, %v2910_v51 }
 0x5dc   : > { %v2913_v29 = vrot.slane %v2912_v3, 2 }
 0x5de   : > { %v2914_v19 = vadd.f32 %v2913_v29, %v2912_v3 }
 0x5e0   : > { %v2915_v60 = vrot.slane %v2914_v19, 1 }
 0x5e2   : > { %v2916_v50 = vadd.f32 %v2915_v60, %v2914_v19 }
 0x5e4   : > { %v2917_v7 = vmul.f32 %v2916_v50, %v4827_v55  ;;  %v3575_v55 = vld [vmem:[%s5065_s1 + $0x2ce] ss:$0 sm:$0xff] }
 0x5e6   : > { %v2918_v25 = vadd.f32 1e-05, %v2917_v7 }
 0x5e8   : > { %3585 = vrsqrt.f32 %v2918_v25  ;;  %vm2925_vm13 = vweird.f32 %v2918_v25 }
 0x5ee   : > { %v3586_v16 = vpop.eup %3585 }
 0x5ef   : > { %v2920_v44 = vmul.f32 %v3586_v16, %v2918_v25  ;;  %vm2926_vm12 = vweird.f32 %v3586_v16 }
 0x5f0   : > { %vm2927_vm14 = vmor %vm2925_vm13, %vm2926_vm12 }
 0x5f1   : > { %v2921_v36 = vmul.f32 %v3586_v16, %v2920_v44 }
 0x5f3   : > { %v2922_v18 = vmul.f32 0.5, %v2921_v36 }
 0x5f5   : > { %v2923_v62 = vsub.f32 1.5, %v2922_v18 }
 0x5f7   : > { %v2924_v13 = vmul.f32 %v3586_v16, %v2923_v62 }
 0x5f9   : > { %v2928_v0 = vsel %vm2927_vm14, %v3586_v16, %v2924_v13 }
 0x5fa   : > { %v2929_v28 = vmul.f32 %v2928_v0, %v2908_v6 }
 0x5fc   : > { %v2931_v23 = vmul.f32 %v3574_v58, %v2929_v28 }
 0x5fe   : > { %v2933_v2 = vadd.f32 %v3575_v55, %v2931_v23 }
 0x600   : > { %v2934_v24 = vmax.f32 %v2933_v2, 0.0 }
 0x602   : > { %2968 = vmatmul.f32.vlgmr.msrb.gmra.mxu0 %v2934_v24 }
 0x67f   : > { %v2969_v10 = vpop.f32.mrf.mxu0 }
 0x680   : > { %v2970_v34 = vadd.f32 %v3576_v20, %v2969_v10 }
 0x682   : > { %2972 = vst [vmem:[#allocation3] sm:$0x3] %v2970_v34 }
 0x683 PF: > { %p3554_p5 = scmp.eq.s32.totalorder %s3688_s13, 1  ;;  %s3660_s14 = smov [#allocation3]  }
 0x684   : > { %s2979_s15 = sshll.u32 %s3660_s14, 4  ;;  %s2981_s18 = sshll.u32 %s5066_s2, 4  ;;  %s2980_s15 = int_to_ptr.vmem [resolvable:$true] %s2979_s15  ;;  %s2982_s18 = int_to_ptr.hbm [resolvable:$true] %s2981_s18 }
 0x685   : > { %3547 = dma.vmem_to_hbm [thread:$0]  (%p3554_p5), %s2980_s15, 32, %s2982_s18, [#allocation4]  }
 0x686   : > { %s2993_s21 = sshll.u32 %s5067_s3, 4  ;;  %s3661_s22 = smov [#allocation5]   ;;  %s2994_s21 = int_to_ptr.hbm [resolvable:$true] %s2993_s21 }
 0x687   : > { %s2991_s23 = sshll.u32 %s3661_s22, 4  ;;  %s2992_s23 = int_to_ptr.vmem [resolvable:$true] %s2991_s23 }
 0x688   : > { %3549 = dma.vmem_to_hbm [thread:$0]  (%p3554_p5), %s2992_s23, 32, %s2994_s21, [#allocation6]  }
 0x689   : > { %3648 = dma.done.wait (%p3554_p5), [#allocation4], 32  }
 0x68a   : > { %3650 = vsyncadd (%p3554_p5), [#allocation4], 4294967264 }
 0x68b   : > { %3652 = dma.done.wait (%p3554_p5), [#allocation6], 32  }
 0x68c   : > { %3654 = vsyncadd (%p3554_p5), [#allocation6], 4294967264 }
 0x68d PF: > { %s16_s12 = sadd.s32 1, %s3657_s12  }
 0x68e   : > { %p13_p6 = scmp.ge.s32.totalorder %s16_s12, 4  }
 0x690   :  { %15 = sbr.rel (!%p13_p6) target bundleno = 2 (0x2), region = 70 }
 0x695   :  { %3012 = vsyncpa [#allocation4], 1 }
 0x696   :  { %3014 = vsyncpa [#allocation4 + $0x1], 1 }
 0x697   :  { %3015 = vsyncpa [#allocation6], 1 }

</bundles_post_ra>
